<compile_context>
chip_gen: v7x
topology: tpu7x:2x2x1
jax: 0.10.0
libtpu: 0.0.40
codegen_flags: <defaults>
</compile_context>

<pallas_src>
import math

import jax
import jax.numpy as jnp
from jax.experimental import pallas as pl
from jax.experimental.pallas import tpu as pltpu


MASK_VALUE = -1e30  # large finite negative (avoids -inf - -inf = NaN paths)


# ----------------------------- Pallas kernel --------------------------------

def mla_flash_kernel(q_map_ref, k_map_ref,                 # scalar prefetch (SMEM)
                     q_cat_ref, kv_cat_ref, v_eff_ref,     # inputs (VMEM tiles)
                     o_ref,                                # output tile
                     m_s, l_s, acc_s):                     # VMEM scratch
    """One grid step = (batch b, head h, triangular step s -> (q_tile, k_tile))."""
    s = pl.program_id(2)
    q_idx = q_map_ref[s]
    k_idx = k_map_ref[s]

    # ---- per-(b, h, q-tile) init: reset online-softmax state ----------------
    @pl.when(k_idx == 0)
    def _init():
        m_s[...] = jnp.full_like(m_s, MASK_VALUE)
        l_s[...] = jnp.zeros_like(l_s)
        acc_s[...] = jnp.zeros_like(acc_s)

    def _process(apply_mask):
        q = q_cat_ref[0, 0]                                 # (Tq, Dp) bf16, pre-scaled
        kv = kv_cat_ref[0]                                  # (Tk, Dp) bf16
        # fused content + RoPE scores; contraction on the shared last dim
        sc = jax.lax.dot_general(q, kv, (((1,), (1,)), ((), ())),
                                 preferred_element_type=jnp.float32)   # (Tq, Tk)
        if apply_mask:
            tq, tk = sc.shape
            row = jax.lax.broadcasted_iota(jnp.int32, (tq, tk), 0)
            col = jax.lax.broadcasted_iota(jnp.int32, (tq, tk), 1)
            sc = jnp.where(row >= col, sc, MASK_VALUE)       # diagonal tile only
        m_prev = m_s[...]                                    # (Tq, 1)
        m_new = jnp.maximum(m_prev, jnp.max(sc, axis=-1, keepdims=True))
        alpha = jnp.exp(m_prev - m_new)
        p = jnp.exp(sc - m_new)
        l_s[...] = alpha * l_s[...] + jnp.sum(p, axis=-1, keepdims=True)
        # accumulate over the full padded width; rope/pad columns are later
        # annihilated by the zero rows of the padded v_eff
        acc_s[...] = alpha * acc_s[...] + jnp.dot(
            p.astype(kv.dtype), kv, preferred_element_type=jnp.float32)
        m_s[...] = m_new

    # strictly-below-diagonal key tiles: no mask needed
    @pl.when(k_idx < q_idx)
    def _inner():
        _process(apply_mask=False)

    # diagonal tile: mask + finalize (upper-triangle tiles never appear in the grid)
    @pl.when(k_idx == q_idx)
    def _diag():
        _process(apply_mask=True)
        inv_l = pl.reciprocal(l_s[...], approx=True)         # EUP
        acc = acc_s[...] * inv_l                             # (Tq, Dp)
        y = jnp.dot(acc.astype(v_eff_ref.dtype), v_eff_ref[0],
                    preferred_element_type=jnp.float32)      # (Tq, hs)
        o_ref[0] = y.astype(o_ref.dtype)
    # TODO(synk): attention-dropout (p=0.2) is identity in eval mode and is not applied.


# ------------------------------- JAX glue ------------------------------------

def _round_up(n, m):
    return ((n + m - 1) // m) * m


def rope_rotate(x, cos, sin):
    """RoPE on interleaved (re, im) pairs of the last dim; time axis is axis -2.
    x: (..., T, D); cos/sin: (T, D//2)."""
    shape = x.shape
    d = shape[-1]
    xf = x.astype(jnp.float32).reshape(shape[:-1] + (d // 2, 2))
    x_re, x_im = xf[..., 0], xf[..., 1]
    bshape = (1,) * (x.ndim - 2) + cos.shape
    c = cos.reshape(bshape)
    s = sin.reshape(bshape)
    out = jnp.stack([x_re * c - x_im * s, x_re * s + x_im * c], axis=-1)
    return out.reshape(shape).astype(x.dtype)


def precompute_absorbed(params, cfg):
    """Weight-only absorbed matrices (mirrors _precompute_absorbed_matrices)."""
    nh, nlq, nlkv = cfg["n_head"], cfg["q_latent_dim"], cfg["kv_latent_dim"]
    C = params["W_uq"].shape[0]
    hs = C // nh
    k_eff = jnp.matmul(
        params["W_uq"].reshape(1, nlq, nh, hs).transpose(0, 2, 1, 3),  # (1, nh, nlq, hs)
        params["W_uk"].reshape(1, nh, hs, nlkv),                       # (1, nh, hs, nlkv)
    )[0]                                                               # (nh, nlq, nlkv)
    v_eff = (params["W_uv"].T @ params["W_o"].T).reshape(nlkv, nh, hs).transpose(1, 0, 2)
    return k_eff, v_eff                                                # (nh, nlkv, hs)


def full_mhla_forward(x, params, k_eff, v_eff, cos, sin, cfg, *,
                      block_size=256, out_dtype=jnp.bfloat16,
                      kv_buffer_count=None, vmem_limit_bytes=None):
    B, T, C = x.shape
    nh, nlq = cfg["n_head"], cfg["q_latent_dim"]
    nlkv, dhr = cfg["kv_latent_dim"], cfg["rope_head_dim"]
    hs = C // nh

    blk = min(block_size, T)
    assert T % blk == 0, "T must be divisible by the attention tile size"
    nt = T // blk

    D = nlkv + dhr
    Dp = _round_up(D, 128)          # lane-dense padded feature width
    cdtype = jnp.bfloat16
    scale = 1.0 / math.sqrt(hs + dhr)

    # ---- latent projections + q/k side packing (small XLA GEMMs, done once) ----
    c_q = x @ params["W_dq"].T                                         # (B, T, nlq)
    c_kv = x @ params["W_dkv"].T                                       # (B, T, nlkv)
    k_r = rope_rotate(x @ params["W_kr"].T, cos, sin)                  # (B, T, dhr)

    # per-head query in the absorbed/latent basis: [c_q @ k_eff | rope(q_r)] * scale
    q_lat = jnp.einsum("btl,hln->bhtn", c_q, k_eff)                    # (B, nh, T, nlkv)
    q_rope = rope_rotate(
        jnp.einsum("btl,hdl->bhtd", c_q, params["W_qr"].reshape(nh, dhr, nlq)),
        cos, sin)                                                      # (B, nh, T, dhr)
    q_cat = jnp.concatenate([q_lat, q_rope], axis=-1) * scale          # (B, nh, T, D)
    q_cat = jnp.pad(q_cat, ((0, 0), (0, 0), (0, 0), (0, Dp - D))).astype(cdtype)

    # key side of the fused score matmul: [c_kv | k_r | 0-pad]
    kv_cat = jnp.concatenate([c_kv, k_r], axis=-1)                     # (B, T, D)
    kv_cat = jnp.pad(kv_cat, ((0, 0), (0, 0), (0, Dp - D))).astype(cdtype)

    # v_eff padded with zero rows for the rope + pad columns of the accumulator
    v_eff_pad = jnp.pad(v_eff, ((0, 0), (0, Dp - nlkv), (0, 0))).astype(cdtype)

    # ---- lower-triangular step -> (q_tile, k_tile) maps (scalar prefetch) ------
    q_ids, k_ids = [], []
    for qi in range(nt):
        for ki in range(qi + 1):
            q_ids.append(qi)
            k_ids.append(ki)
    q_map = jnp.asarray(q_ids, dtype=jnp.int32)
    k_map = jnp.asarray(k_ids, dtype=jnp.int32)
    tri_steps = len(q_ids)

    kv_spec_kwargs = {}
    if kv_buffer_count is not None:     # e.g. 3 on v5e to hide kv DMA latency
        kv_spec_kwargs["pipeline_mode"] = pl.Buffered(kv_buffer_count)

    y = pl.pallas_call(
        mla_flash_kernel,
        out_shape=jax.ShapeDtypeStruct((B, T, C), out_dtype),
        grid_spec=pltpu.PrefetchScalarGridSpec(
            num_scalar_prefetch=2,
            grid=(B, nh, tri_steps),
            in_specs=[
                pl.BlockSpec((1, 1, blk, Dp),
                             lambda b, h, s, qm, km: (b, h, qm[s], 0)),        # q_cat
                pl.BlockSpec((1, blk, Dp),
                             lambda b, h, s, qm, km: (b, km[s], 0),
                             **kv_spec_kwargs),                                # kv_cat
                pl.BlockSpec((1, Dp, hs),
                             lambda b, h, s, qm, km: (h, 0, 0)),               # v_eff
            ],
            # output written directly in (B, T, C): head h owns columns [h*hs, (h+1)*hs)
            out_specs=pl.BlockSpec((1, blk, hs),
                                   lambda b, h, s, qm, km: (b, qm[s], h)),
            scratch_shapes=[
                pltpu.VMEM((blk, 1), jnp.float32),     # running max
                pltpu.VMEM((blk, 1), jnp.float32),     # running sum
                pltpu.VMEM((blk, Dp), jnp.float32),    # latent accumulator
            ],
        ),
        compiler_params=pltpu.CompilerParams(
            dimension_semantics=("parallel", "parallel", "arbitrary"),
            vmem_limit_bytes=vmem_limit_bytes),
    )(q_map, k_map, q_cat, kv_cat, v_eff_pad)

    # TODO(synk): decode path with an incoming kv_cache (c_kv / k_r concat) is not
    #             implemented here; this kernel covers the prefill (kv_cache=None) case.
    updated_kv_cache = {"c_kv": c_kv, "k_r": k_r[:, None, :, :]}
    return y, updated_kv_cache


# ---------------------- pure-JAX reference (for checking) -------------------

def reference_forward(x, p, cos, sin, cfg):
    B, T, C = x.shape
    nh, nlq = cfg["n_head"], cfg["q_latent_dim"]
    nlkv, dhr = cfg["kv_latent_dim"], cfg["rope_head_dim"]
    hs = C // nh

    def rope_bthd(t):
        d = t.shape[-1]
        tf = t.astype(jnp.float32).reshape(t.shape[:-1] + (d // 2, 2))
        tr, ti = tf[..., 0], tf[..., 1]
        c = cos[None, :, None, :]
        s = sin[None, :, None, :]
        return jnp.stack([tr * c - ti * s, tr * s + ti * c], -1).reshape(t.shape)

    c_q = x @ p["W_dq"].T
    c_kv = x @ p["W_dkv"].T
    k_eff = jnp.matmul(p["W_uq"].reshape(1, nlq, nh, hs).transpose(0, 2, 1, 3),
                       p["W_uk"].reshape(1, nh, hs, nlkv))
    v_eff = (p["W_uv"].T @ p["W_o"].T).reshape(nlkv, nh, hs).transpose(1, 0, 2)[None]
    attn_c = jnp.matmul(jnp.matmul(c_q[:, None], k_eff),
                        jnp.swapaxes(c_kv, -1, -2)[:, None])
    k_r = jnp.swapaxes(rope_bthd((x @ p["W_kr"].T)[:, :, None, :]), 1, 2)
    q_r = jnp.swapaxes(rope_bthd((c_q @ p["W_qr"].T).reshape(B, T, nh, dhr)), 1, 2)
    attn_r = jnp.matmul(q_r, jnp.swapaxes(k_r, -1, -2))
    attn = (attn_c + attn_r) / math.sqrt(hs + dhr)
    qi = jnp.arange(T)[:, None]
    ki = jnp.arange(T)[None, :]
    attn = jnp.where((qi >= ki)[None, None], attn, -jnp.inf)
    attn = jax.nn.softmax(attn, axis=-1)
    y = jnp.matmul(jnp.matmul(attn, c_kv[:, None]), v_eff)
    return jnp.swapaxes(y, 1, 2).reshape(B, T, C)


# --------------------------------- main --------------------------------------

if __name__ == "__main__":
    # Small demo shapes consistent with FullMHLA's forward contract.
    # hs = C // nh = 128 keeps the direct (B, T, C) output layout lane-dense;
    # latent / rope dims match the module's config (nlq=nlkv=32, dhr=16).
    # T=128 with a 32-token tile exercises init / inner / diagonal branches of
    # the triangular grid (4 q-tiles -> 10 triangular steps).
    B, T, C = 2, 128, 256
    cfg = dict(n_head=2, q_latent_dim=32, kv_latent_dim=32, rope_head_dim=16)
    nh, nlq, nlkv, dhr = cfg["n_head"], cfg["q_latent_dim"], cfg["kv_latent_dim"], cfg["rope_head_dim"]
    hs = C // nh

    key = jax.random.PRNGKey(0)
    ks = jax.random.split(key, 9)
    sd = 0.1
    params = {
        "W_dq":  sd * jax.random.normal(ks[0], (nlq, C),        jnp.float32),
        "W_uq":  sd * jax.random.normal(ks[1], (C, nlq),        jnp.float32),
        "W_dkv": sd * jax.random.normal(ks[2], (nlkv, C),       jnp.float32),
        "W_uk":  sd * jax.random.normal(ks[3], (C, nlkv),       jnp.float32),
        "W_uv":  sd * jax.random.normal(ks[4], (C, nlkv),       jnp.float32),
        "W_qr":  sd * jax.random.normal(ks[5], (nh * dhr, nlq), jnp.float32),
        "W_kr":  sd * jax.random.normal(ks[6], (dhr, C),        jnp.float32),
        "W_o":   sd * jax.random.normal(ks[7], (C, C),          jnp.float32),
    }
    x = jax.random.normal(ks[8], (B, T, C), jnp.float32)

    # RoPE frequencies for the decoupled rope head dim (freqs_cis = cos + i*sin).
    inv_freq = 1.0 / (10000.0 ** (jnp.arange(0, dhr, 2, dtype=jnp.float32) / dhr))
    t = jnp.arange(T, dtype=jnp.float32)
    angles = t[:, None] * inv_freq[None, :]
    cos, sin = jnp.cos(angles), jnp.sin(angles)

    # absorbed matrices precomputed once (inference path of the module)
    k_eff, v_eff = precompute_absorbed(params, cfg)

    y, kv_cache = full_mhla_forward(x, params, k_eff, v_eff, cos, sin, cfg,
                                    block_size=32)
    y = jax.block_until_ready(y)

    y_ref = reference_forward(x, params, cos, sin, cfg)
    assert y.shape == (B, T, C)
    y_f32 = y.astype(jnp.float32)
    max_err = float(jnp.max(jnp.abs(y_f32 - y_ref)))
    assert jnp.allclose(y_f32, y_ref, atol=5e-2, rtol=5e-2), \
        f"mismatch vs reference (max abs err {max_err})"

    print("KERNEL_OK")
</pallas_src>

<mosaic_0001>
module attributes {stable_mosaic.version = 11 : i64} {
  func.func @mla_flash_kernel(%arg0: i32, %arg1: i32, %arg2: i32, %arg3: memref<10xi32, #tpu.memory_space<smem>>, %arg4: memref<10xi32, #tpu.memory_space<smem>>, %arg5: memref<1x1x32x128xbf16, #tpu.memory_space<vmem>>, %arg6: memref<1x32x128xbf16, #tpu.memory_space<vmem>>, %arg7: memref<1x128x128xbf16, #tpu.memory_space<vmem>>, %arg8: memref<1x32x128xbf16, #tpu.memory_space<vmem>>, %arg9: memref<32x1xf32, #tpu.memory_space<vmem>>, %arg10: memref<32x1xf32, #tpu.memory_space<vmem>>, %arg11: memref<32x128xf32, #tpu.memory_space<vmem>>) attributes {dimension_semantics = [#tpu.dimension_semantics<parallel>, #tpu.dimension_semantics<parallel>, #tpu.dimension_semantics<arbitrary>], iteration_bounds = array<i64: 2, 2, 10>, scalar_prefetch = 2 : i64, scratch_operands = 3 : i64, tpu.core_type = #tpu.core_type<tc>, window_params = [{transform_indices = @transform_0, window_bounds = array<i64: 1, 1, 32, 128>}, {transform_indices = @transform_1, window_bounds = array<i64: 1, 32, 128>}, {transform_indices = @transform_2, window_bounds = array<i64: 1, 128, 128>}, {transform_indices = @transform_3, window_bounds = array<i64: 1, 32, 128>}]} {
    %0 = arith.index_cast %arg2 : i32 to index
    %1 = memref.load %arg3[%0] : memref<10xi32, #tpu.memory_space<smem>>
    %2 = arith.index_cast %arg2 : i32 to index
    %3 = memref.load %arg4[%2] : memref<10xi32, #tpu.memory_space<smem>>
    %c0_i32 = arith.constant 0 : i32
    %4 = arith.cmpi eq, %3, %c0_i32 : i32
    %5 = arith.extui %4 : i1 to i32
    %c0_i32_0 = arith.constant 0 : i32
    %6 = arith.cmpi ne, %5, %c0_i32_0 : i32
    scf.if %6 {
      %cst = arith.constant -1.000000e+30 : f32
      %13 = vector.broadcast %cst : f32 to vector<32x1xf32>
      %c0 = arith.constant 0 : index
      %c0_3 = arith.constant 0 : index
      %14 = vector.load %arg9[%c0, %c0_3] : memref<32x1xf32, #tpu.memory_space<vmem>>, vector<32x1xf32>
      tpu.vector_store %arg9[%c0, %c0_3], %13 {strides = array<i32>} : memref<32x1xf32, #tpu.memory_space<vmem>>, vector<32x1xf32>,
      %cst_4 = arith.constant 0.000000e+00 : f32
      %15 = vector.broadcast %cst_4 : f32 to vector<32x1xf32>
      %c0_5 = arith.constant 0 : index
      %c0_6 = arith.constant 0 : index
      %16 = vector.load %arg10[%c0_5, %c0_6] : memref<32x1xf32, #tpu.memory_space<vmem>>, vector<32x1xf32>
      tpu.vector_store %arg10[%c0_5, %c0_6], %15 {strides = array<i32>} : memref<32x1xf32, #tpu.memory_space<vmem>>, vector<32x1xf32>,
      %cst_7 = arith.constant 0.000000e+00 : f32
      %17 = vector.broadcast %cst_7 : f32 to vector<32x128xf32>
      %c0_8 = arith.constant 0 : index
      %c0_9 = arith.constant 0 : index
      %18 = vector.load %arg11[%c0_8, %c0_9] : memref<32x128xf32, #tpu.memory_space<vmem>>, vector<32x128xf32>
      tpu.vector_store %arg11[%c0_8, %c0_9], %17 {strides = array<i32>} : memref<32x128xf32, #tpu.memory_space<vmem>>, vector<32x128xf32>,
    } else {
    }
    %7 = arith.cmpi slt, %3, %1 : i32
    %8 = arith.extui %7 : i1 to i32
    %c0_i32_1 = arith.constant 0 : i32
    %9 = arith.cmpi ne, %8, %c0_i32_1 : i32
    scf.if %9 {
      %c0 = arith.constant 0 : index
      %c0_3 = arith.constant 0 : index
      %c0_4 = arith.constant 0 : index
      %c0_5 = arith.constant 0 : index
      %13 = vector.load %arg5[%c0, %c0_3, %c0_4, %c0_5] : memref<1x1x32x128xbf16, #tpu.memory_space<vmem>>, vector<1x1x32x128xbf16>
      %14 = vector.shape_cast %13 : vector<1x1x32x128xbf16> to vector<32x128xbf16>
      %c0_6 = arith.constant 0 : index
      %c0_7 = arith.constant 0 : index
      %c0_8 = arith.constant 0 : index
      %15 = vector.load %arg6[%c0_6, %c0_7, %c0_8] : memref<1x32x128xbf16, #tpu.memory_space<vmem>>, vector<1x32x128xbf16>
      %16 = vector.shape_cast %15 : vector<1x32x128xbf16> to vector<32x128xbf16>
      %cst = arith.constant dense<0.000000e+00> : vector<32x32xf32>
      %17 = tpu.matmul %14, %16, %cst {dimension_numbers = #tpu.dot_dimension_numbers<[1], [1], [0], [0], [0, 0, 1, 0], [], []>} : vector<32x128xbf16>, vector<32x128xbf16>, vector<32x32xf32> -> vector<32x32xf32>
      %c0_9 = arith.constant 0 : index
      %c0_10 = arith.constant 0 : index
      %18 = vector.load %arg9[%c0_9, %c0_10] : memref<32x1xf32, #tpu.memory_space<vmem>>, vector<32x1xf32>
      %cst_11 = arith.constant dense<0xFF800000> : vector<32xf32>
      %19 = vector.multi_reduction <maximumf>, %17, %cst_11 [1] : vector<32x32xf32> to vector<32xf32>
      %20 = vector.shape_cast %19 : vector<32xf32> to vector<32x1xf32>
      %21 = arith.maximumf %18, %20 : vector<32x1xf32>
      %22 = arith.subf %18, %21 : vector<32x1xf32>
      %23 = math.exp %22 : vector<32x1xf32>
      %24 = vector.broadcast %21 : vector<32x1xf32> to vector<32x32xf32>
      %25 = arith.subf %17, %24 : vector<32x32xf32>
      %26 = math.exp %25 : vector<32x32xf32>
      %c0_12 = arith.constant 0 : index
      %c0_13 = arith.constant 0 : index
      %27 = vector.load %arg10[%c0_12, %c0_13] : memref<32x1xf32, #tpu.memory_space<vmem>>, vector<32x1xf32>
      %28 = arith.mulf %23, %27 : vector<32x1xf32>
      %cst_14 = arith.constant dense<0.000000e+00> : vector<32xf32>
      %29 = vector.multi_reduction <add>, %26, %cst_14 [1] : vector<32x32xf32> to vector<32xf32>
      %30 = vector.shape_cast %29 : vector<32xf32> to vector<32x1xf32>
      %31 = arith.addf %28, %30 : vector<32x1xf32>
      %c0_15 = arith.constant 0 : index
      %c0_16 = arith.constant 0 : index
      %32 = vector.load %arg10[%c0_15, %c0_16] : memref<32x1xf32, #tpu.memory_space<vmem>>, vector<32x1xf32>
      tpu.vector_store %arg10[%c0_15, %c0_16], %31 {strides = array<i32>} : memref<32x1xf32, #tpu.memory_space<vmem>>, vector<32x1xf32>,
      %c0_17 = arith.constant 0 : index
      %c0_18 = arith.constant 0 : index
      %33 = vector.load %arg11[%c0_17, %c0_18] : memref<32x128xf32, #tpu.memory_space<vmem>>, vector<32x128xf32>
      %34 = vector.broadcast %23 : vector<32x1xf32> to vector<32x128xf32>
      %35 = arith.mulf %34, %33 : vector<32x128xf32>
      %36 = arith.truncf %26 : vector<32x32xf32> to vector<32x32xbf16>
      %cst_19 = arith.constant dense<0.000000e+00> : vector<32x128xf32>
      %37 = tpu.matmul %36, %16, %cst_19 {dimension_numbers = #tpu.dot_dimension_numbers<[1], [0], [0], [1], [0, 0, 1, 1], [], []>} : vector<32x32xbf16>, vector<32x128xbf16>, vector<32x128xf32> -> vector<32x128xf32>
      %38 = arith.addf %35, %37 : vector<32x128xf32>
      %c0_20 = arith.constant 0 : index
      %c0_21 = arith.constant 0 : index
      %39 = vector.load %arg11[%c0_20, %c0_21] : memref<32x128xf32, #tpu.memory_space<vmem>>, vector<32x128xf32>
      tpu.vector_store %arg11[%c0_20, %c0_21], %38 {strides = array<i32>} : memref<32x128xf32, #tpu.memory_space<vmem>>, vector<32x128xf32>,
      %c0_22 = arith.constant 0 : index
      %c0_23 = arith.constant 0 : index
      %40 = vector.load %arg9[%c0_22, %c0_23] : memref<32x1xf32, #tpu.memory_space<vmem>>, vector<32x1xf32>
      tpu.vector_store %arg9[%c0_22, %c0_23], %21 {strides = array<i32>} : memref<32x1xf32, #tpu.memory_space<vmem>>, vector<32x1xf32>,
    } else {
    }
    %10 = arith.cmpi eq, %3, %1 : i32
    %11 = arith.extui %10 : i1 to i32
    %c0_i32_2 = arith.constant 0 : i32
    %12 = arith.cmpi ne, %11, %c0_i32_2 : i32
    scf.if %12 {
      %c0 = arith.constant 0 : index
      %c0_3 = arith.constant 0 : index
      %c0_4 = arith.constant 0 : index
      %c0_5 = arith.constant 0 : index
      %13 = vector.load %arg5[%c0, %c0_3, %c0_4, %c0_5] : memref<1x1x32x128xbf16, #tpu.memory_space<vmem>>, vector<1x1x32x128xbf16>
      %14 = vector.shape_cast %13 : vector<1x1x32x128xbf16> to vector<32x128xbf16>
      %c0_6 = arith.constant 0 : index
      %c0_7 = arith.constant 0 : index
      %c0_8 = arith.constant 0 : index
      %15 = vector.load %arg6[%c0_6, %c0_7, %c0_8] : memref<1x32x128xbf16, #tpu.memory_space<vmem>>, vector<1x32x128xbf16>
      %16 = vector.shape_cast %15 : vector<1x32x128xbf16> to vector<32x128xbf16>
      %cst = arith.constant dense<0.000000e+00> : vector<32x32xf32>
      %17 = tpu.matmul %14, %16, %cst {dimension_numbers = #tpu.dot_dimension_numbers<[1], [1], [0], [0], [0, 0, 1, 0], [], []>} : vector<32x128xbf16>, vector<32x128xbf16>, vector<32x32xf32> -> vector<32x32xf32>
      %18 = tpu.iota {dimensions = array<i32: 0>} : vector<32x32xi32>
      %19 = tpu.iota {dimensions = array<i32: 1>} : vector<32x32xi32>
      %20 = arith.cmpi sge, %18, %19 : vector<32x32xi32>
      %cst_9 = arith.constant -1.000000e+30 : f32
      %21 = vector.broadcast %cst_9 : f32 to vector<32x32xf32>
      %22 = arith.select %20, %17, %21 : vector<32x32xi1>, vector<32x32xf32>
      %c0_10 = arith.constant 0 : index
      %c0_11 = arith.constant 0 : index
      %23 = vector.load %arg9[%c0_10, %c0_11] : memref<32x1xf32, #tpu.memory_space<vmem>>, vector<32x1xf32>
      %cst_12 = arith.constant dense<0xFF800000> : vector<32xf32>
      %24 = vector.multi_reduction <maximumf>, %22, %cst_12 [1] : vector<32x32xf32> to vector<32xf32>
      %25 = vector.shape_cast %24 : vector<32xf32> to vector<32x1xf32>
      %26 = arith.maximumf %23, %25 : vector<32x1xf32>
      %27 = arith.subf %23, %26 : vector<32x1xf32>
      %28 = math.exp %27 : vector<32x1xf32>
      %29 = vector.broadcast %26 : vector<32x1xf32> to vector<32x32xf32>
      %30 = arith.subf %22, %29 : vector<32x32xf32>
      %31 = math.exp %30 : vector<32x32xf32>
      %c0_13 = arith.constant 0 : index
      %c0_14 = arith.constant 0 : index
      %32 = vector.load %arg10[%c0_13, %c0_14] : memref<32x1xf32, #tpu.memory_space<vmem>>, vector<32x1xf32>
      %33 = arith.mulf %28, %32 : vector<32x1xf32>
      %cst_15 = arith.constant dense<0.000000e+00> : vector<32xf32>
      %34 = vector.multi_reduction <add>, %31, %cst_15 [1] : vector<32x32xf32> to vector<32xf32>
      %35 = vector.shape_cast %34 : vector<32xf32> to vector<32x1xf32>
      %36 = arith.addf %33, %35 : vector<32x1xf32>
      %c0_16 = arith.constant 0 : index
      %c0_17 = arith.constant 0 : index
      %37 = vector.load %arg10[%c0_16, %c0_17] : memref<32x1xf32, #tpu.memory_space<vmem>>, vector<32x1xf32>
      tpu.vector_store %arg10[%c0_16, %c0_17], %36 {strides = array<i32>} : memref<32x1xf32, #tpu.memory_space<vmem>>, vector<32x1xf32>,
      %c0_18 = arith.constant 0 : index
      %c0_19 = arith.constant 0 : index
      %38 = vector.load %arg11[%c0_18, %c0_19] : memref<32x128xf32, #tpu.memory_space<vmem>>, vector<32x128xf32>
      %39 = vector.broadcast %28 : vector<32x1xf32> to vector<32x128xf32>
      %40 = arith.mulf %39, %38 : vector<32x128xf32>
      %41 = arith.truncf %31 : vector<32x32xf32> to vector<32x32xbf16>
      %cst_20 = arith.constant dense<0.000000e+00> : vector<32x128xf32>
      %42 = tpu.matmul %41, %16, %cst_20 {dimension_numbers = #tpu.dot_dimension_numbers<[1], [0], [0], [1], [0, 0, 1, 1], [], []>} : vector<32x32xbf16>, vector<32x128xbf16>, vector<32x128xf32> -> vector<32x128xf32>
      %43 = arith.addf %40, %42 : vector<32x128xf32>
      %c0_21 = arith.constant 0 : index
      %c0_22 = arith.constant 0 : index
      %44 = vector.load %arg11[%c0_21, %c0_22] : memref<32x128xf32, #tpu.memory_space<vmem>>, vector<32x128xf32>
      tpu.vector_store %arg11[%c0_21, %c0_22], %43 {strides = array<i32>} : memref<32x128xf32, #tpu.memory_space<vmem>>, vector<32x128xf32>,
      %c0_23 = arith.constant 0 : index
      %c0_24 = arith.constant 0 : index
      %45 = vector.load %arg9[%c0_23, %c0_24] : memref<32x1xf32, #tpu.memory_space<vmem>>, vector<32x1xf32>
      tpu.vector_store %arg9[%c0_23, %c0_24], %26 {strides = array<i32>} : memref<32x1xf32, #tpu.memory_space<vmem>>, vector<32x1xf32>,
      %c0_25 = arith.constant 0 : index
      %c0_26 = arith.constant 0 : index
      %46 = vector.load %arg10[%c0_25, %c0_26] : memref<32x1xf32, #tpu.memory_space<vmem>>, vector<32x1xf32>
      %47 = tpu.reciprocal %46 {approx = true} : vector<32x1xf32> -> vector<32x1xf32>
      %c0_27 = arith.constant 0 : index
      %c0_28 = arith.constant 0 : index
      %48 = vector.load %arg11[%c0_27, %c0_28] : memref<32x128xf32, #tpu.memory_space<vmem>>, vector<32x128xf32>
      %49 = vector.broadcast %47 : vector<32x1xf32> to vector<32x128xf32>
      %50 = arith.mulf %48, %49 : vector<32x128xf32>
      %51 = arith.truncf %50 : vector<32x128xf32> to vector<32x128xbf16>
      %c0_29 = arith.constant 0 : index
      %c0_30 = arith.constant 0 : index
      %c0_31 = arith.constant 0 : index
      %52 = vector.load %arg7[%c0_29, %c0_30, %c0_31] : memref<1x128x128xbf16, #tpu.memory_space<vmem>>, vector<1x128x128xbf16>
      %53 = vector.shape_cast %52 : vector<1x128x128xbf16> to vector<128x128xbf16>
      %cst_32 = arith.constant dense<0.000000e+00> : vector<32x128xf32>
      %54 = tpu.matmul %51, %53, %cst_32 {dimension_numbers = #tpu.dot_dimension_numbers<[1], [0], [0], [1], [0, 0, 1, 1], [], []>} : vector<32x128xbf16>, vector<128x128xbf16>, vector<32x128xf32> -> vector<32x128xf32>
      %55 = arith.truncf %54 : vector<32x128xf32> to vector<32x128xbf16>
      %c0_33 = arith.constant 0 : index
      %c0_34 = arith.constant 0 : index
      %c0_35 = arith.constant 0 : index
      %56 = vector.load %arg8[%c0_33, %c0_34, %c0_35] : memref<1x32x128xbf16, #tpu.memory_space<vmem>>, vector<1x32x128xbf16>
      %57 = vector.shape_cast %56 : vector<1x32x128xbf16> to vector<32x128xbf16>
      %58 = vector.shape_cast %55 : vector<32x128xbf16> to vector<1x32x128xbf16>
      tpu.vector_store %arg8[%c0_33, %c0_34, %c0_35], %58 {strides = array<i32>} : memref<1x32x128xbf16, #tpu.memory_space<vmem>>, vector<1x32x128xbf16>,
    } else {
    }
    return
  }
  func.func @transform_0(%arg0: i32, %arg1: i32, %arg2: i32, %arg3: memref<10xi32, #tpu.memory_space<smem>>, %arg4: memref<10xi32, #tpu.memory_space<smem>>) -> (i32, i32, i32, i32) {
    %0 = arith.index_cast %arg2 : i32 to index
    %1 = memref.load %arg3[%0] : memref<10xi32, #tpu.memory_space<smem>>
    %c0_i32 = arith.constant 0 : i32
    %c0_i32_0 = arith.constant 0 : i32
    return %arg0, %arg1, %1, %c0_i32 : i32, i32, i32, i32
  }
  func.func @transform_1(%arg0: i32, %arg1: i32, %arg2: i32, %arg3: memref<10xi32, #tpu.memory_space<smem>>, %arg4: memref<10xi32, #tpu.memory_space<smem>>) -> (i32, i32, i32) {
    %0 = arith.index_cast %arg2 : i32 to index
    %1 = memref.load %arg4[%0] : memref<10xi32, #tpu.memory_space<smem>>
    %c0_i32 = arith.constant 0 : i32
    %c0_i32_0 = arith.constant 0 : i32
    return %arg0, %1, %c0_i32 : i32, i32, i32
  }
  func.func @transform_2(%arg0: i32, %arg1: i32, %arg2: i32, %arg3: memref<10xi32, #tpu.memory_space<smem>>, %arg4: memref<10xi32, #tpu.memory_space<smem>>) -> (i32, i32, i32) {
    %c0_i32 = arith.constant 0 : i32
    %c0_i32_0 = arith.constant 0 : i32
    %c0_i32_1 = arith.constant 0 : i32
    return %arg1, %c0_i32, %c0_i32_0 : i32, i32, i32
  }
  func.func @transform_3(%arg0: i32, %arg1: i32, %arg2: i32, %arg3: memref<10xi32, #tpu.memory_space<smem>>, %arg4: memref<10xi32, #tpu.memory_space<smem>>) -> (i32, i32, i32) {
    %0 = arith.index_cast %arg2 : i32 to index
    %1 = memref.load %arg3[%0] : memref<10xi32, #tpu.memory_space<smem>>
    %c0_i32 = arith.constant 0 : i32
    return %arg0, %1, %arg1 : i32, i32, i32
  }
}

</mosaic_0001>

<bundles_post_ra>
// kernel: tpu_custom_call.1
= control target key start
LH: loop header
LB: loop body
LE: loop exit
PB: predicated region body
PF: predicated region fallthrough
CT: control target
= control target key end

     0   :  { %s2616_s0 = inlined_call_operand.hbm [shape: s32[10], index: 0, kind: input, shape index: {}]   ;;  %s2617_s2 = inlined_call_operand.hbm [shape: bf16[2,2,128,128], index: 2, kind: input, shape index: {}]   ;;  %s2618_s3 = inlined_call_operand.hbm [shape: bf16[2,128,128], index: 3, kind: input, shape index: {}]   ;;  %s2619_s4 = inlined_call_operand.hbm [shape: bf16[2,128,128], index: 4, kind: input, shape index: {}]   ;;  %s2620_s5 = inlined_call_operand.hbm [shape: bf16[2,128,256], index: 5, kind: output, shape index: {}]   ;;  %s2621_s1 = inlined_call_operand.vmem [shape: s32[10], index: 1, kind: input, shape index: {}]  }
   0x1   :  { %2657 = sst [smem:[#allocation43_spill]] %s2617_s2  ;;  %s1654_s20 = scalar_lea.hbm %s2616_s0, 16 }
   0x2   :  { %2658 = sst [smem:[#allocation44_spill]] %s2618_s3  ;;  %p1655_p0 = scmp.ne.s32.totalorder %s2616_s0, %s1654_s20 }
   0x3   :  { %2659 = sst [smem:[#allocation45_spill]] %s2619_s4  ;;  %p1658_p1 = scmp.lt.u32.totalorder %s1654_s20, %s2616_s0 }
   0x4   :  { %2660 = sst [smem:[#allocation46_spill]] %s2620_s5 }
   0x5   :  { %p1660_p2 = pnand %p1658_p1, %p1655_p0 }
   0x7   :  { %1663 = shalt.err (!%p1660_p2)  }
   0x8   :  { %s1964_s25 = smov [#allocation6]   ;;  %s12_s30 = sshll.u32 %s2621_s1, 4  ;;  %s13_s30 = int_to_ptr.vmem [resolvable:$true] %s12_s30 }
   0x9   :  { %11 = dma.hbm_to_smem %s2616_s0, 16, %s1964_s25, [#allocation5] }
   0xa   :  { %s1664_s6 = scalar_lea.vmem %s13_s30, 16  ;;  %p1669_p4 = scmp.lt.s32.totalorder %s13_s30, %s13_s30 }
   0xb   :  { %p1665_p3 = scmp.ne.s32.totalorder %s13_s30, %s1664_s6  ;;  %p1670_p5 = scmp.lt.s32.totalorder %s1664_s6, %s1664_s6 }
   0xd   :  { %p1671_p6 = por %p1670_p5, %p1669_p4 }
   0xf   :  { %p1672_p7 = pnand %p1671_p6, %p1665_p3 }
  0x11   :  { %1675 = shalt.err (!%p1672_p7)  }
  0x12   :  { %s1965_s7 = smov [#allocation7]  }
  0x13   :  { %15 = dma.vmem_to_smem %s13_s30, 16, %s1965_s7, [#allocation5] }
  0x14   :  { %1870 = dma.done.wait [#allocation5], 32 }
  0x15   :  { %1871 = vsyncadd [#allocation5], 4294967264 }
  0x16   :  { %17 = sfence }
  0x17   :  { %18 = vsyncpa [#allocation9], 0 }
  0x18   :  { %20 = vsyncpa [#allocation9 + $0x1], 0 }
  0x19   :  { %21 = vsyncpa [#allocation12], 0 }
  0x1a   :  { %23 = vsyncpa [#allocation12 + $0x1], 0 }
  0x1b   :  { %24 = vsyncpa [#allocation10], 0 }
  0x1c   :  { %26 = vsyncpa [#allocation10 + $0x1], 0  ;;  %s2024_s0 = smov 0   ;;  %s2026_s1 = smov 0  }
  0x1d   :  { %s2028_s8 = smov 0   ;;  %s2030_s9 = smov 0  }
  0x1e   :  { %s2032_s10 = smov 0   ;;  %s2034_s11 = smov 0  }
  0x1f   :  { %s2036_s12 = smov 0   ;;  %s2038_s13 = smov 0  }
  0x20   :  { %s2040_s14 = smov 0   ;;  %s2042_s15 = smov 0  }
  0x21   :  { %s2044_s16 = smov 0   ;;  %s2046_s17 = smov 0  }
  0x22   :  { %s2048_s18 = smov 0   ;;  %s2050_s19 = smov 0  }
  0x23   :  { %s2052_s20 = smov 0   ;;  %s2054_s21 = smov 0  }
  0x24   :  { %s2056_s22 = smov 0   ;;  %s2058_s23 = smov 0  }
  0x25   :  { %s2060_s24 = smov 0  }
  0x26 LB: > { %2661 = sst [smem:[#allocation25_spill]] %s1890_s0  ;;  %s2118_s25 = sadd.s32 4294967295, %s1962_s24   ;;  %s1962_s24 = sphi %s2060_s24, %s32_s24   ;;  %s1958_s23 = sphi %s2058_s23, %s2743_s23   ;;  %s1954_s22 = sphi %s2056_s22, %s2754_s22   ;;  %s1950_s21 = sphi %s2054_s21, %s2753_s21   ;;  %s1946_s20 = sphi %s2052_s20, %s2739_s20   ;;  %s1942_s19 = sphi %s2050_s19, %s2738_s19   ;;  %s1938_s18 = sphi %s2048_s18, %s2752_s18   ;;  %s1934_s17 = sphi %s2046_s17, %s2751_s17   ;;  %s1930_s16 = sphi %s2044_s16, %s2750_s16   ;;  %s1926_s15 = sphi %s2042_s15, %s2737_s15   ;;  %s1922_s14 = sphi %s2040_s14, %s2749_s14   ;;  %s1918_s13 = sphi %s2038_s13, %s2748_s13   ;;  %s1914_s12 = sphi %s2036_s12, %s2735_s12   ;;  %s1910_s11 = sphi %s2034_s11, %s2747_s11   ;;  %s1906_s10 = sphi %s2032_s10, %s2746_s10   ;;  %s1902_s9 = sphi %s2030_s9, %s2745_s9   ;;  %s1898_s8 = sphi %s2028_s8, %s2744_s8   ;;  %s1894_s1 = sphi %s2026_s1, %s2742_s1   ;;  %s1890_s0 = sphi %s2024_s0, %s2734_s0  }
  0x27   : > { %2662 = sst [smem:[#allocation26_spill]] %s1894_s1  ;;  %s1248_s26 = sadd.s32 4294967294, %s1962_s24  }
  0x28   : > { %2663 = sst [smem:[#allocation27_spill]] %s1918_s13  ;;  %p2636_p8 = scmp.eq.s32.totalorder %s1962_s24, 0 }
  0x29   : > { %2664 = sst [smem:[#allocation28_spill]] %s1930_s16  ;;  %p2635_p9 = scmp.eq.s32.totalorder %s2118_s25, 0 }
  0x2a   : > { %2665 = sst [smem:[#allocation29_spill]] %s1938_s18  ;;  %p101_p10 = scmp.ne.s32.totalorder %s1922_s14, %s1918_s13 }
  0x2b   : > { %2666 = sst [smem:[#allocation30_spill]] %s1942_s19  ;;  %p107_p11 = scmp.ne.s32.totalorder %s1918_s13, %s1914_s12 }
  0x2c   : > { %2667 = sst [smem:[#allocation31_spill]] %s1946_s20  ;;  %p2136_p12 = por %p101_p10, %p2636_p8 }
  0x2d   : > { %2668 = sst [smem:[#allocation32_spill]] %s1954_s22  ;;  %p162_p13 = scmp.ne.s32.totalorder %s1898_s8, %s1894_s1 }
  0x2e   : > { %2669 = sst [smem:[#allocation33_spill]] %s1958_s23  ;;  %p2144_p0 = por %p107_p11, %p2635_p9 }
  0x2f   : > { %s2125_s28 = sld [smem:[#allocation7 + %s1950_s21]]  ;;  %p163_p1 = scmp.eq.s32.totalorder %s2118_s25, 39 }
  0x30   : > { %s2132_s30 = sld [smem:[#allocation6 + %s1950_s21]]  ;;  %p168_p2 = scmp.ne.s32.totalorder %s1894_s1, %s1890_s0 }
  0x31   : > { %s2671_s7 = scalar_select %p2144_p0, 1, 0 }
  0x32   : > { %p169_p3 = scmp.eq.s32.totalorder %s1248_s26, 39  ;;  %p2151_p4 = por %p163_p1, %p162_p13 }
  0x33   : > { %2672 = sst [smem:[#allocation34_spill]] %s2671_s7  ;;  %p2634_p6 = scmp.lt.s32.totalorder %s1962_s24, 40 }
  0x34   : > { %s2673_s12 = scalar_select %p2151_p4, 1, 0 }
  0x35   : > { %p2155_p5 = por %p169_p3, %p168_p2  ;;  %s215_s27 = sand.u32 1, %s1962_s24  }
  0x36   : > { %2674 = sst [smem:[#allocation35_spill]] %s2673_s12  ;;  %s217_s5 = sand.u32 1, %s1922_s14  }
  0x37   : > { %s2675_s29 = scalar_select %p2155_p5, 1, 0 }
  0x38   : > { %s1256_s19 = sshll.u32 %s217_s5, 4  ;;  %s1258_s20 = sshll.u32 %s1958_s23, 4 }
  0x39   : > { %2676 = sst [smem:[#allocation36_spill]] %s2675_s29  ;;  %s219_s26 = scalar_lea.vmem [#allocation11], %s1256_s19 }
  0x3a   : > { %s1400_s18 = scalar_select %p2136_p12, [#allocation7], [#allocation16] }
  0x3b   : > { %s1401_s0 = scalar_select %p2136_p12, %s1950_s21, 0 }
  0x3c   : > { %s2756_s18 = smov (!%p2634_p6, %s1400_s18), [#allocation19]  ;;  %s229_s12 = sshll.u32 %s219_s26, 4  ;;  %s2180_s12 = int_to_ptr.vmem [resolvable:$true] %s229_s12 }
  0x3d   : > { %s2758_s0 = smov (!%p2634_p6, %s1401_s0), 0  ;;  %p2176_p7 = pnand %p2634_p6, %p2136_p12 }
  0x3e   : > { %s220_s5 = sld [smem:[%s2756_s18 + %s2758_s0]]  ;;  %p1263_p10 = scmp.ge.s32.totalorder %s1962_s24, 1 }
  0x3f   : > { %p258_p11 = scmp.lt.s32.totalorder %s1962_s24, 41  ;;  %s2680_s3 = sld [smem:[#allocation44_spill]] }
  0x40   : > { %s2193_s0 = scalar_lea.sflag [#allocation12], %s215_s27  ;;  %p1678_p1 = pneg %p2176_p7 }
  0x41   : > { %p2184_p13 = pnand %p1263_p10, %p258_p11  ;;  %2681 = sst [smem:[#allocation38_spill]] %s2193_s0 }
  0x43   : > { %s2678_s1 = scalar_select %p2184_p13, 1, 0 }
  0x44   : > { %s1257_s7 = sshll.u32 %s220_s5, 2 }
  0x45   : > { %2679 = sst [smem:[#allocation37_spill]] %s2678_s1  ;;  %s226_s19 = sadd.s32 %s1258_s20, %s1257_s7 }
  0x46   : > { %s1259_s26 = sshll.u32 %s226_s19, 6  ;;  %s1681_s13 = scalar_lea.hbm %s2680_s3, 2048 }
  0x47   : > { %s2191_s4 = scalar_lea.hbm %s2680_s3, %s1259_s26 }
  0x48   : > { %s1676_s18 = scalar_lea.hbm %s2191_s4, 256  ;;  %p1682_p10 = scmp.lt.u32.totalorder %s2191_s4, %s2680_s3 }
  0x49   : > { %p1677_p12 = scmp.ne.s32.totalorder %s2191_s4, %s1676_s18  ;;  %p1683_p11 = scmp.lt.u32.totalorder %s1681_s13, %s1676_s18 }
  0x4a   : > { %p1685_p9 = scmp.lt.u32.totalorder %s1676_s18, %s2191_s4 }
  0x4b   : > { %p1679_p2 = pnand %p1678_p1, %p1677_p12  ;;  %p1684_p6 = por %p1683_p11, %p1682_p10 }
  0x4d   : > { %p1680_p3 = pneg %p1679_p2  ;;  %p1686_p8 = por %p1685_p9, %p1684_p6 }
  0x4f   : > { %p1687_p5 = pnand %p1686_p8, %p1680_p3 }
  0x51   : > { %1690 = shalt.err (!%p1687_p5)
}
  0x52   : > { %s1691_s27 = scalar_lea.vmem %s2180_s12, 256  ;;  %s1966_s26 = smov [#allocation11]  }
  0x53   : > { %p1692_p12 = scmp.ne.s32.totalorder %s2180_s12, %s1691_s27  ;;  %s1696_s6 = sshll.u32 %s1966_s26, 4  ;;  %s1697_s6 = int_to_ptr.vmem [resolvable:$false] %s1696_s6 }
  0x54   : > { %s1698_s20 = scalar_lea.vmem %s1697_s6, 512  ;;  %p1699_p0 = scmp.lt.s32.totalorder %s2180_s12, %s1697_s6 }
  0x55   : > { %p1694_p2 = pnand %p1692_p12, %p1678_p1  ;;  %p1700_p10 = scmp.lt.s32.totalorder %s1698_s20, %s1691_s27 }
  0x57   : > { %p1695_p4 = pneg %p1694_p2  ;;  %p1701_p11 = por %p1700_p10, %p1699_p0 }
  0x59   : > { %p1702_p9 = pnand %p1701_p11, %p1695_p4 }
  0x5b   : > { %1705 = shalt.err (!%p1702_p9)
}
  0x5c   : > { %s2639_s18 = smov 64   ;;  %s2641_s7 = smov 4  }
  0x5d   : > { %1421 = dma.hbm_to_vmem [thread:$0]  (!%p2176_p7), %s2191_s4, 256, %s2180_s12, %s2193_s0, %s2639_s18, %s2639_s18, %s2641_s7  }
  0x5e   : > { %s44_s13 = sadd.s32 1, %s1950_s21  ;;  %s47_s5 = sadd.s32 1, %s1954_s22 }
  0x5f   : > { %p45_p8 = scmp.ge.s32.totalorder %s44_s13, 10  ;;  %s55_s19 = sld [smem:[#allocation6 + %s1950_s21]] }
  0x60   : > { %p71_p0 = scmp.ne.s32.totalorder %s1934_s17, %s1930_s16  ;;  %p2683_p4 = scmp.eq.s32.totalorder %s1962_s24, 0 }
  0x61   : > { %s2760_s13 = smov (%p45_p8, %s44_s13), 0  ;;  %s2762_s5 = smov (!%p45_p8, %s47_s5), %s1954_s22 }
  0x62   : > { %2682 = sst [smem:[#allocation39_spill]] %s2760_s13  ;;  %p2236_p5 = por %p2683_p4, %p71_p0 }
  0x63   : > { %s56_s4 = sld [smem:[#allocation6 + %s2760_s13]]  ;;  %p49_p6 = scmp.ge.s32.totalorder %s2762_s5, 2 }
  0x64   : > { %p77_p7 = scmp.ne.s32.totalorder %s1930_s16, %s1926_s15  ;;  %s88_s12 = sld [smem:[#allocation7 + %s2760_s13]] }
  0x65   : > { %s144_s26 = sld [smem:[#allocation6 + %s2760_s13]]  ;;  %s2764_s5 = smov (%p49_p6, %s2762_s5), 0 }
  0x66   : > { %2685 = sst [smem:[#allocation40_spill]] %s2764_s5  ;;  %s2686_s6 = sadd.s32 1, %s1958_s23 }
  0x67   : > { %s2766_s6 = smov (!%p49_p6, %s2686_s6), %s1958_s23  ;;  %s2251_s20 = ssub.s32 %s1954_s22, %s2764_s5 }
  0x68   : > { %p2687_p1 = scmp.eq.s32.totalorder %s2118_s25, 0  ;;  %p53_p12 = scmp.ge.s32.totalorder %s2766_s6, 2 }
  0x69   : > { %s60_s15 = ssub.s32 %s55_s19, %s56_s4  ;;  %s152_s7 = sadd.s32 1, %s1898_s8 }
  0x6a   : > { %p2255_p3 = por %p2687_p1, %p77_p7  ;;  %s2768_s6 = smov (%p53_p12, %s2766_s6), 0 }
  0x6b   : > { %2690 = sst [smem:[#allocation42_spill]] %s2768_s6  ;;  %s90_s3 = ssub.s32 %s2125_s28, %s88_s12 }
  0x6c   : > { %s2688_s18 = scalar_select %p2255_p3, 1, 0 }
  0x6d   : > { %s146_s5 = ssub.s32 %s2132_s30, %s144_s26  ;;  %s57_s13 = ssub.s32 %s1958_s23, %s2768_s6 }
  0x6e   : > { %2689 = sst [smem:[#allocation41_spill]] %s2688_s18  ;;  %s59_s18 = sor.u32 %s2251_s20, %s57_s13 }
  0x6f   : > { %s91_s16 = sor.u32 %s90_s3, %s57_s13  ;;  %s61_s19 = sor.u32 %s60_s15, %s59_s18 }
  0x70   : > { %p92_p2 = scmp.eq.s32.totalorder %s91_s16, 0  ;;  %p62_p10 = scmp.eq.s32.totalorder %s61_s19, 0 }
  0x71   : > { %s147_s4 = sor.u32 %s146_s5, %s57_s13  ;;  %s2691_s27 = sadd.s32 1, %s1922_s14 }
  0x72   : > { %s2271_s1 = scalar_select %p92_p2, %s1922_s14, %s2691_s27  }
  0x73   : > { %s2692_s0 = sadd.s32 1, %s1934_s17  ;;  %s149_s30 = sor.u32 %s147_s4, %s2251_s20 }
  0x74   : > { %s2276_s28 = scalar_select %p62_p10, %s1934_s17, %s2692_s0  }
  0x75   : > { %s2693_s12 = sand.u32 1, %s1934_s17   ;;  %p150_p11 = scmp.eq.s32.totalorder %s149_s30, 0 }
  0x76   : > { %s1251_s26 = sshll.u32 %s2693_s12, 4  ;;  %p2694_p9 = scmp.lt.s32.totalorder %s1962_s24, 40 }
  0x77   : > { %s1397_s3 = scalar_select %p2236_p5, [#allocation6], [#allocation15] }
  0x78   : > { %s2284_s16 = scalar_select %p150_p11, %s1898_s8, %s152_s7  }
  0x79   : > { %s1398_s18 = scalar_select %p2236_p5, %s1950_s21, 0 }
  0x7a   : > { %s2770_s3 = smov (!%p2694_p9, %s1397_s3), [#allocation18]  ;;  %p2695_p8 = pmov %p2694_p9 }
  0x7b   : > { %s1253_s0 = sshll.u32 %s1954_s22, 4  ;;  %s1254_s13 = sshll.u32 %s1958_s23, 5 }
  0x7c   : > { %s2772_s18 = smov (!%p2695_p8, %s1398_s18), 0  ;;  %s193_s27 = scalar_lea.vmem [#allocation8], %s1251_s26 }
  0x7d   : > { %s194_s5 = sld [smem:[%s2770_s3 + %s2772_s18]]  ;;  %s205_s15 = sshll.u32 %s193_s27, 4  ;;  %s2295_s15 = int_to_ptr.vmem [resolvable:$true] %s205_s15 }
  0x7e   : > { %p2696_p0 = pmov %p2695_p8  ;;  %s120_s4 = sadd.s32 1, %s1910_s11 }
  0x7f   : > { %p127_p7 = scmp.ne.s32.totalorder %s1910_s11, %s1906_s10  ;;  %p133_p1 = scmp.ne.s32.totalorder %s1906_s10, %s1902_s9 }
  0x80   : > { %p2301_p4 = pnand %p2696_p0, %p2236_p5  ;;  %p2698_p12 = scmp.eq.s32.totalorder %s1962_s24, 0 }
  0x81   : > { %s2700_s2 = sld [smem:[#allocation43_spill]]  ;;  %p2701_p5 = scmp.eq.s32.totalorder %s2118_s25, 0 }
  0x82   : > { %p2313_p2 = por %p127_p7, %p2698_p12  ;;  %s2703_s9 = sand.u32 1, %s1934_s17  }
  0x83   : > { %s1252_s19 = sshll.u32 %s194_s5, 2  ;;  %p2324_p10 = por %p133_p1, %p2701_p5 }
  0x84   : > { %s200_s30 = sadd.s32 %s1253_s0, %s1252_s19  ;;  %p1708_p9 = pneg %p2301_p4 }
  0x85   : > { %s202_s12 = sadd.s32 %s1254_s13, %s200_s30  ;;  %s2330_s13 = scalar_lea.sflag [#allocation9], %s2703_s9 }
  0x86   : > { %s1255_s3 = sshll.u32 %s202_s12, 6 }
  0x87   : > { %s2320_s27 = scalar_lea.hbm %s2700_s2, %s1255_s3  ;;  %s1711_s12 = scalar_lea.hbm %s2700_s2, 4096 }
  0x88   : > { %s2702_s0 = scalar_select %p2324_p10, 1, 0 }
  0x89   : > { %s1706_s5 = scalar_lea.hbm %s2320_s27, 256  ;;  %p1712_p7 = scmp.lt.u32.totalorder %s2320_s27, %s2700_s2 }
  0x8a   : > { %p1707_p11 = scmp.ne.s32.totalorder %s2320_s27, %s1706_s5  ;;  %p1713_p1 = scmp.lt.u32.totalorder %s1711_s12, %s1706_s5 }
  0x8b   : > { %p1715_p5 = scmp.lt.u32.totalorder %s1706_s5, %s2320_s27 }
  0x8c   : > { %p1709_p8 = pnand %p1708_p9, %p1707_p11  ;;  %p1714_p12 = por %p1713_p1, %p1712_p7 }
  0x8e   : > { %p1710_p0 = pneg %p1709_p8  ;;  %p1716_p6 = por %p1715_p5, %p1714_p12 }
  0x90   : > { %p1717_p10 = pnand %p1716_p6, %p1710_p0 }
  0x92   : > { %1720 = shalt.err (!%p1717_p10)
}
  0x93   : > { %s1721_s18 = scalar_lea.vmem %s2295_s15, 256  ;;  %s1969_s9 = smov [#allocation8]  }
  0x94   : > { %p1722_p11 = scmp.ne.s32.totalorder %s2295_s15, %s1721_s18  ;;  %s1726_s19 = sshll.u32 %s1969_s9, 4  ;;  %s1727_s19 = int_to_ptr.vmem [resolvable:$false] %s1726_s19 }
  0x95   : > { %s1728_s30 = scalar_lea.vmem %s1727_s19, 512  ;;  %p1729_p13 = scmp.lt.s32.totalorder %s2295_s15, %s1727_s19 }
  0x96   : > { %p1724_p8 = pnand %p1722_p11, %p1708_p9  ;;  %p1730_p7 = scmp.lt.s32.totalorder %s1728_s30, %s1721_s18 }
  0x98   : > { %p1725_p3 = pneg %p1724_p8  ;;  %p1731_p1 = por %p1730_p7, %p1729_p13 }
  0x9a   : > { %p1732_p12 = pnand %p1731_p1, %p1725_p3 }
  0x9c   : > { %1735 = shalt.err (!%p1732_p12)
}
  0x9d   : > { %s2704_s5 = smov 4   ;;  %s2705_s12 = smov 64  }
  0x9e   : > { %1416 = dma.hbm_to_vmem [thread:$0]  (!%p2301_p4), %s2320_s27, 256, %s2295_s15, %s2330_s13, %s2705_s12, %s2705_s12, %s2704_s5  }
  0x9f   : > { %p2706_p13 = scmp.eq.s32.totalorder %s2251_s20, 0  ;;  %s241_s29 = sand.u32 1, %s1910_s11  }
  0xa0   : > { %s1302_s7 = sshll.u32 %s1954_s22, 10  ;;  %s1260_s18 = sshll.u32 %s241_s29, 6 }
  0xa1   : > { %s2366_s3 = scalar_select %p2706_p13, %s1910_s11, %s120_s4  }
  0xa2   : > { %s2707_s30 = sld [smem:[#allocation45_spill]]  ;;  %p2708_p3 = scmp.lt.s32.totalorder %s1962_s24, 40 }
  0xa3   : > { %s243_s20 = scalar_lea.vmem [#allocation13], %s1260_s18 }
  0xa4   : > { %p2379_p6 = pnand %p2708_p3, %p2313_p2  ;;  %s250_s4 = sshll.u32 %s243_s20, 4  ;;  %s2383_s4 = int_to_ptr.vmem [resolvable:$true] %s250_s4 }
  0xa6   : > { %p1738_p10 = pneg %p2379_p6 }
  0xa8   : > { %s2373_s2 = scalar_lea.hbm %s2707_s30, %s1302_s7  ;;  %s1741_s29 = scalar_lea.hbm %s2707_s30, 2048 }
  0xa9   : > { %s1736_s27 = scalar_lea.hbm %s2373_s2, 1024  ;;  %p1742_p2 = scmp.lt.u32.totalorder %s2373_s2, %s2707_s30 }
  0xaa   : > { %p1737_p4 = scmp.ne.s32.totalorder %s2373_s2, %s1736_s27  ;;  %p1743_p5 = scmp.lt.u32.totalorder %s1741_s29, %s1736_s27 }
  0xab   : > { %p1745_p8 = scmp.lt.u32.totalorder %s1736_s27, %s2373_s2 }
  0xac   : > { %p1739_p9 = pnand %p1738_p10, %p1737_p4  ;;  %p1744_p11 = por %p1743_p5, %p1742_p2 }
  0xae   : > { %p1740_p0 = pneg %p1739_p9  ;;  %p1746_p7 = por %p1745_p8, %p1744_p11 }
  0xb0   : > { %p1747_p1 = pnand %p1746_p7, %p1740_p0 }
  0xb2   : > { %1750 = shalt.err (!%p1747_p1)
}
  0xb3   : > { %s1751_s18 = scalar_lea.vmem %s2383_s4, 1024  ;;  %s1970_s19 = smov [#allocation13]  }
  0xb4   : > { %p1752_p12 = scmp.ne.s32.totalorder %s2383_s4, %s1751_s18  ;;  %s1756_s20 = sshll.u32 %s1970_s19, 4  ;;  %s1757_s20 = int_to_ptr.vmem [resolvable:$false] %s1756_s20 }
  0xb5   : > { %s1758_s26 = scalar_lea.vmem %s1757_s20, 2048  ;;  %p1759_p4 = scmp.lt.s32.totalorder %s2383_s4, %s1757_s20 }
  0xb6   : > { %p1754_p13 = pnand %p1752_p12, %p1738_p10  ;;  %p1760_p9 = scmp.lt.s32.totalorder %s1758_s26, %s1751_s18 }
  0xb8   : > { %p1755_p3 = pneg %p1754_p13  ;;  %p1761_p2 = por %p1760_p9, %p1759_p4 }
  0xba   : > { %p1762_p5 = pnand %p1761_p2, %p1755_p3 }
  0xbc   : > { %1765 = shalt.err (!%p1762_p5)
}
  0xbd   : > { %s2710_s27 = sld [smem:[#allocation38_spill]]  ;;  %s2711_s13 = sld [smem:[#allocation37_spill]] }
  0xc3   : > { %1424 = dma.hbm_to_vmem [thread:$0]  (!%p2379_p6), %s2373_s2, 1024, %s2383_s4, %s2710_s27, %s2705_s12, %s2705_s12, %s2704_s5  }
  0xc4   : > { %p2712_p10 = scmp.ne.s32.totalorder %s2711_s13, 0 }
  0xc5   : > { %s2713_s29 = sld [smem:[#allocation28_spill]] (!%p2712_p10)  ;;  %s2714_s7 = sld [smem:[#allocation41_spill]] (!%p2712_p10) }
  0xc6   : > { %262 = sbr.rel (%p2712_p10) target bundleno = 2069 (0x815), region = 32 }
  0xcb   : > { %s264_s9 = sand.u32 (!%p2712_p10), 1, %s2713_s29   ;;  %p2715_p0 = scmp.ne.s32.totalorder (!%p2712_p10), %s2714_s7, 0 }
  0xcc   : > { %s1264_s19 = sshll.u32 (!%p2712_p10), %s264_s9, 4  ;;  %s265_s18 = scalar_lea.sflag (!%p2712_p10), [#allocation9], %s264_s9 }
  0xcd   : > { %s2417_s20 = scalar_lea.vmem [#allocation8], %s1264_s19 }
  0xce   : > { %1873 = dma.done.wait (%p2715_p0), %s265_s18, 256  }
  0xcf   : > { %1875 = vsyncadd (%p2715_p0), %s265_s18, 4294967040  ;;  %s2716_s15 = sld [smem:[#allocation27_spill]]  ;;  %s2717_s26 = sld [smem:[#allocation34_spill]] }
  0xd0   : > { %s273_s30 = sand.u32 1, %s2118_s25  }
  0xd1   : > { %s274_s12 = scalar_lea.sflag [#allocation12], %s273_s30 }
  0xd5   : > { %s275_s2 = sand.u32 1, %s2716_s15   ;;  %p2718_p6 = scmp.ne.s32.totalorder %s2717_s26, 0 }
  0xd6   : > { %s1265_s5 = sshll.u32 %s275_s2, 4 }
  0xd7   : > { %s2425_s4 = scalar_lea.vmem [#allocation11], %s1265_s5 }
  0xd8   : > { %1877 = dma.done.wait (%p2718_p6), %s274_s12, 256  }
  0xd9   : > { %1879 = vsyncadd (%p2718_p6), %s274_s12, 4294967040  ;;  %s284_s27 = sand.u32 1, %s1906_s10   ;;  %p2719_p11 = scmp.ne.s32.totalorder %s2702_s0, 0 }
  0xda   : > { %s1266_s13 = sshll.u32 %s284_s27, 6 }
  0xdb   : > { %s2432_s29 = scalar_lea.vmem [#allocation13], %s1266_s13 }
  0xdc   : > { %1881 = dma.done.wait (%p2719_p11), %s274_s12, 1024  }
  0xdd   : > { %1883 = vsyncadd (%p2719_p11), %s274_s12, 4294966272  ;;  %s2720_s25 = sld [smem:[#allocation26_spill]]  ;;  %s2721_s30 = sld [smem:[#allocation29_spill]] }
  0xe3   : > { %s2653_s7 = sand.u32 1, %s2720_s25   ;;  %s2440_s9 = sld [smem:[#allocation6 + %s2721_s30]] }
  0xe4   : > { %s2443_s19 = sld [smem:[#allocation7 + %s2721_s30]]  ;;  %s1267_s18 = sshll.u32 %s2653_s7, 4 }
  0xe5   : > { %s2447_s15 = scalar_lea.vmem [#allocation14], %s1267_s18 }
  0xea   : > { %p1268_p8 = scmp.ne.s32.totalorder %s2443_s19, 0 }
  0xeb   : > { %vm332_vm0 = vcmask (!%p1268_p8), 7168   ;;  %v1971_v0 = vmov (!%p1268_p8), -1e+30   ;;  %v1972_v1 = vmov (!%p1268_p8), 0.0  }
  0xec   : > { %331 = sbr.rel (%p1268_p8) target bundleno = 243 (0xf3), region = 48  ;;  %333 = vst.msk [vmem:[#allocation2] sm:$0xff] (!%p1268_p8), %vm332_vm0, %v1971_v0  ;;  %334 = vst.msk [vmem:[#allocation2 + $0x8] sm:$0xff] (!%p1268_p8), %vm332_vm0, %v1971_v0 }
  0xed   : > { %335 = vst.msk [vmem:[#allocation2 + $0x10] sm:$0xff] (!%p1268_p8), %vm332_vm0, %v1971_v0  ;;  %336 = vst.msk [vmem:[#allocation2 + $0x18] sm:$0xff] (!%p1268_p8), %vm332_vm0, %v1971_v0 }
  0xee   : > { %337 = vst.msk [vmem:[#allocation3] sm:$0xff] (!%p1268_p8), %vm332_vm0, %v1972_v1  ;;  %338 = vst.msk [vmem:[#allocation3 + $0x8] sm:$0xff] (!%p1268_p8), %vm332_vm0, %v1972_v1 }
  0xef   : > { %339 = vst.msk [vmem:[#allocation3 + $0x10] sm:$0xff] (!%p1268_p8), %vm332_vm0, %v1972_v1  ;;  %340 = vst.msk [vmem:[#allocation3 + $0x18] sm:$0xff] (!%p1268_p8), %vm332_vm0, %v1972_v1 }
  0xf0   : > { %341 = vst [vmem:[#allocation4] sm:$0xff] (!%p1268_p8), %v1972_v1  ;;  %342 = vst [vmem:[#allocation4 + $0x8] sm:$0xff] (!%p1268_p8), %v1972_v1 }
  0xf1   : > { %343 = vst [vmem:[#allocation4 + $0x10] sm:$0xff] (!%p1268_p8), %v1972_v1  ;;  %344 = vst [vmem:[#allocation4 + $0x18] sm:$0xff] (!%p1268_p8), %v1972_v1 }
  0xf3 PF: > { %p1269_p7 = scmp.ge.s32.totalorder %s2443_s19, %s2440_s9 }
  0xf4   : > { %v1596_v2 = vld [vmem:[%s2425_s4] sm:$0xff] (!%p1269_p7)   ;;  %v1597_v3 = vld [vmem:[%s2425_s4 + $0x8] sm:$0xff] (!%p1269_p7)   ;;  %vm434_vm1 = vcmask (!%p1269_p7), 261120   ;;  %v1973_v14 = vmov (!%p1269_p7), 0   ;;  %vm519_vm2 = vcmask (!%p1269_p7), 7168  }
  0xf5   : > { %348 = sbr.rel (%p1269_p7) target bundleno = 990 (0x3de), region = 52  ;;  %1345 = vmatprep.subr.bf16.mxu0 (!%p1269_p7), %v1596_v2  ;;  %v1598_v4 = vld [vmem:[%s2417_s20] sm:$0xff] (!%p1269_p7)   ;;  %1353 = vmatprep.subr.bf16.mxu1 (!%p1269_p7), %v1596_v2  ;;  %v1599_v5 = vld [vmem:[%s2417_s20 + $0x8] sm:$0xff] (!%p1269_p7)  }
  0xf6   : > { %1346 = vmatpush3.bf16.xpose.msra.mxu0 (!%p1269_p7), %v1596_v2  ;;  %1354 = vmatpush3.bf16.msra.mxu1 (!%p1269_p7), %v1596_v2  ;;  %v432_v15 = vld [vmem:[#allocation2 + $0x10] sm:$0xff] (!%p1269_p7)  ;;  %v430_v16 = vld [vmem:[#allocation2] sm:$0xff] (!%p1269_p7)  ;;  %v433_v21 = vld [vmem:[#allocation2 + $0x18] sm:$0xff] (!%p1269_p7) }
  0xf7   : > { %1347 = vmatprep.subr.bf16.mxu0 (!%p1269_p7), %v1597_v3  ;;  %1349 = vmatprep.mubr.bf16.mxu0 (!%p1269_p7), %v1598_v4  ;;  %v431_v23 = vld [vmem:[#allocation2 + $0x8] sm:$0xff] (!%p1269_p7)  ;;  %v497_v62 = vld [vmem:[#allocation3 + $0x10] sm:$0xff] (!%p1269_p7)  ;;  %v495_v1 = vld [vmem:[#allocation3] sm:$0xff] (!%p1269_p7) }
  0xf8   : > { %1355 = vmatprep.subr.bf16.mxu1 (!%p1269_p7), %v1597_v3  ;;  %1595 = vset.pattern.permute.xlu1 (!%p1269_p7), %v1973_v14 }
  0xf9   : > { %1594 = vset.pattern.permute.xlu0 (!%p1269_p7), %v1973_v14 }
  0xfa   : > { %1356 = vmatpush3.bf16.msra.mxu1 (!%p1269_p7), %v1597_v3 }
  0xfe   : > { %1348 = vmatpush3.bf16.xpose.msra.mxu0 %v1597_v3  ;;  %v496_v3 = vld [vmem:[#allocation3 + $0x8] sm:$0xff] }
 0x105   : > { %1350 = vmatmul.mubr.bf16.vlgmr.msra.gmra.mrb[0].mxu0 %v1599_v5 }
 0x1d8   : > { %v1351_v6 = vpop.f32.mrb[0].mxu0 }
 0x1d9   : > { %v415_v7 = vpop.f32.mrb[1].mxu0  ;;  %v441_v8 = vsel %vm434_vm1, %v1351_v6, -inf }
 0x1da   : > { %442 = vmax.xlane.f32.xlu1 %v441_v8  ;;  %v1352_v9 = vpop.f32.mrb[2].mxu0  ;;  %v435_v10 = vsel %vm434_vm1, %v415_v7, -inf }
 0x1db   : > { %436 = vmax.xlane.f32.xlu0 %v435_v10  ;;  %v418_v11 = vpop.f32.mrb[3].mxu0  ;;  %v444_v12 = vsel %vm434_vm1, %v1352_v9, -inf }
 0x1dc   : > { %v438_v13 = vsel %vm434_vm1, %v418_v11, -inf }
 0x1de   : > { %445 = vmax.xlane.f32.xlu1 %v444_v12 }
 0x1df   : > { %439 = vmax.xlane.f32.xlu0 %v438_v13 }
 0x267   : > { %v443_v17 = vpop.xlane.xlu1 %442 }
 0x268   : > { %v449_v18 = vmax.f32 %v432_v15, %v443_v17  ;;  %v437_v19 = vpop.xlane.xlu0 %436  ;;  %v527_v17 = vld [vmem:[#allocation4 + $0x18] sm:$0xff] }
 0x269   : > { %v447_v20 = vmax.f32 %v430_v16, %v437_v19 }
 0x26a   : > { %v453_v22 = vsub.f32 %v432_v15, %v449_v18  ;;  %619 = vst.msk [vmem:[#allocation2 + $0x10] sm:$0xff] %vm519_vm2, %v449_v18  ;;  %475 = vperm.xlu1 %1595, %v449_v18   ;;  %v526_v15 = vld [vmem:[#allocation4 + $0x10] sm:$0xff] }
 0x26b   : > { %v451_v24 = vsub.f32 %v430_v16, %v447_v20  ;;  %617 = vst.msk [vmem:[#allocation2] sm:$0xff] %vm519_vm2, %v447_v20  ;;  %v446_v25 = vpop.xlane.xlu1 %445  ;;  %465 = vperm.xlu0 %1594, %v447_v20   ;;  %v524_v16 = vld [vmem:[#allocation4] sm:$0xff]  ;;  %v525_v20 = vld [vmem:[#allocation4 + $0x8] sm:$0xff] }
 0x26c   : > { %v450_v26 = vmax.f32 %v433_v21, %v446_v25  ;;  %v440_v27 = vpop.xlane.xlu0 %439  ;;  %v459_v55 = vmul.f32 1.442695, %v453_v22 }
 0x26d   : > { %v455_v28 = vmul.f32 1.442695, %v451_v24  ;;  %v448_v29 = vmax.f32 %v431_v23, %v440_v27 }
 0x26e   : > { %v454_v30 = vsub.f32 %v433_v21, %v450_v26  ;;  %620 = vst.msk [vmem:[#allocation2 + $0x18] sm:$0xff] %vm519_vm2, %v450_v26 }
 0x26f   : > { %1600 = vpow2.f32 %v455_v28  ;;  %v452_v31 = vsub.f32 %v431_v23, %v448_v29  ;;  %618 = vst.msk [vmem:[#allocation2 + $0x8] sm:$0xff] %vm519_vm2, %v448_v29  ;;  %470 = vperm.xlu1 %1595, %v448_v29  }
 0x270   : > { %v461_v57 = vmul.f32 1.442695, %v454_v30 }
 0x271   : > { %v457_v56 = vmul.f32 1.442695, %v452_v31 }
 0x273   : > { %480 = vperm.xlu1 %1595, %v450_v26  }
 0x279   : > { %v1601_v32 = vpop.eup %1600 }
 0x27a   : > { %530 = vperm.xlu1 %1595, %v1601_v32   ;;  %v499_v4 = vmul.f32 %v1601_v32, %v495_v1 }
 0x2e9   : > { %v476_v33 = vpop.permute.xlu1 %475 }
 0x2ea   : > { %v485_v34 = vsub.f32 %v1351_v6, %v476_v33  ;;  %v466_v35 = vpop.permute.xlu0 %465 }
 0x2eb   : > { %v483_v36 = vsub.f32 %v415_v7, %v466_v35 }
 0x2ec   : > { %v491_v37 = vmul.f32 1.442695, %v485_v34 }
 0x2ed   : > { %v487_v38 = vmul.f32 1.442695, %v483_v36 }
 0x2ee   : > { %1602 = vpow2.f32 %v491_v37  ;;  %v471_v39 = vpop.permute.xlu1 %470 }
 0x2ef   : > { %v484_v40 = vsub.f32 %v418_v11, %v471_v39  ;;  %1604 = vpow2.f32 %v487_v38 }
 0x2f1   : > { %v489_v41 = vmul.f32 1.442695, %v484_v40 }
 0x2f2   : > { %v481_v42 = vpop.permute.xlu1 %480 }
 0x2f3   : > { %1606 = vpow2.f32 %v489_v41  ;;  %v486_v43 = vsub.f32 %v1352_v9, %v481_v42  ;;  %v498_v9 = vld [vmem:[#allocation3 + $0x18] sm:$0xff] }
 0x2f5   : > { %v493_v44 = vmul.f32 1.442695, %v486_v43 }
 0x2f7   : > { %1608 = vpow2.f32 %v493_v44 }
 0x2f8   : > { %v1603_v45 = vpop.eup %1602  ;;  %1610 = vpow2.f32 %v459_v55 }
 0x2f9   : > { %v509_v46 = vsel %vm434_vm1, %v1603_v45, 0.0  ;;  %v1605_v47 = vpop.eup %1604  ;;  %1612 = vpow2.f32 %v457_v56  ;;  %v531_v61 = vpop.permute.xlu1 %530 }
 0x2fa   : > { %510 = vadd.xlane.f32.xlu1 %v509_v46  ;;  %v503_v49 = vsel %vm434_vm1, %v1605_v47, 0.0  ;;  %1614 = vpow2.f32 %v461_v57  ;;  %v548_v22 = vmul.f32 %v531_v61, %v524_v16 }
 0x2fd   : > { %v1607_v48 = vpop.eup %1606 }
 0x2fe   : > { %504 = vadd.xlane.f32.xlu1 %v503_v49  ;;  %v506_v50 = vsel %vm434_vm1, %v1607_v48, 0.0  ;;  %v552_v51 = vpack.c.bf16 %v1607_v48, %v1605_v47 }
 0x2ff   : > { %507 = vadd.xlane.f32.xlu0 %v506_v50 }
 0x300   : > { %1357 = vmatprep.mubr.msk.bf16.mxu1 %vm434_vm1, %v552_v51 }
 0x301   : > { %v1609_v52 = vpop.eup %1608 }
 0x302   : > { %v512_v53 = vsel %vm434_vm1, %v1609_v52, 0.0  ;;  %v553_v54 = vpack.c.bf16 %v1609_v52, %v1603_v45  ;;  %v1611_v58 = vpop.eup %1610 }
 0x303   : > { %513 = vadd.xlane.f32.xlu1 %v512_v53  ;;  %v1613_v59 = vpop.eup %1612  ;;  %v501_v63 = vmul.f32 %v1611_v58, %v497_v62 }
 0x304   : > { %1358 = vmatmul.mubr.msk.bf16.vlgmr.msra.gmra.mrb[0].mxu1 %vm434_vm1, %v553_v54  ;;  %v1615_v60 = vpop.eup %1614  ;;  %v500_v6 = vmul.f32 %v1613_v59, %v496_v3 }
 0x305   : > { %v502_v11 = vmul.f32 %v1615_v60, %v498_v9 }
 0x314   : > { %540 = vperm.xlu1 %1595, %v1611_v58  }
 0x315   : > { %535 = vperm.xlu0 %1594, %v1613_v59  }
 0x318   : > { %545 = vperm.xlu1 %1595, %v1615_v60  }
 0x387   : > { %v511_v0 = vpop.xlane.xlu1 %510 }
 0x388   : > { %v517_v2 = vadd.f32 %v511_v0, %v501_v63 }
 0x38a   : > { %522 = vst.msk [vmem:[#allocation3 + $0x10] sm:$0xff] %vm519_vm2, %v517_v2 }
 0x38b   : > { %v505_v5 = vpop.xlane.xlu1 %504 }
 0x38c   : > { %v515_v7 = vadd.f32 %v505_v5, %v499_v4  ;;  %v508_v8 = vpop.xlane.xlu0 %507 }
 0x38d   : > { %v516_v10 = vadd.f32 %v508_v8, %v500_v6 }
 0x38e   : > { %520 = vst.msk [vmem:[#allocation3] sm:$0xff] %vm519_vm2, %v515_v7 }
 0x38f   : > { %521 = vst.msk [vmem:[#allocation3 + $0x8] sm:$0xff] %vm519_vm2, %v516_v10 }
 0x390   : > { %v514_v12 = vpop.xlane.xlu1 %513 }
 0x391   : > { %v518_v13 = vadd.f32 %v514_v12, %v502_v11 }
 0x393   : > { %523 = vst.msk [vmem:[#allocation3 + $0x18] sm:$0xff] %vm519_vm2, %v518_v13 }
 0x394   : > { %v541_v14 = vpop.permute.xlu1 %540  ;;  %v536_v21 = vpop.permute.xlu0 %535 }
 0x395   : > { %v550_v19 = vmul.f32 %v541_v14, %v526_v15  ;;  %v549_v27 = vmul.f32 %v536_v21, %v525_v20 }
 0x398   : > { %v546_v18 = vpop.permute.xlu1 %545 }
 0x399   : > { %v551_v24 = vmul.f32 %v546_v18, %v527_v17 }
 0x3d7   : > { %v1359_v23 = vpop.f32.mrb[0].mxu1 }
 0x3d8   : > { %v611_v25 = vadd.f32 %v1359_v23, %v550_v19  ;;  %v594_v26 = vpop.f32.mrb[1].mxu1 }
 0x3d9   : > { %v609_v28 = vadd.f32 %v594_v26, %v548_v22  ;;  %v1360_v29 = vpop.f32.mrb[2].mxu1 }
 0x3da   : > { %615 = vst [vmem:[#allocation4 + $0x10] sm:$0xff] %v611_v25  ;;  %v612_v30 = vadd.f32 %v1360_v29, %v551_v24  ;;  %v597_v31 = vpop.f32.mrb[3].mxu1 }
 0x3db   : > { %613 = vst [vmem:[#allocation4] sm:$0xff] %v609_v28  ;;  %v610_v32 = vadd.f32 %v597_v31, %v549_v27 }
 0x3dc   : > { %616 = vst [vmem:[#allocation4 + $0x18] sm:$0xff] %v612_v30 }
 0x3dd   : > { %614 = vst [vmem:[#allocation4 + $0x8] sm:$0xff] %v610_v32 }
 0x3de PF: > { %p1276_p1 = scmp.ne.s32.totalorder %s2443_s19, %s2440_s9 }
 0x3df   : > { %v1618_v33 = vld [vmem:[%s2425_s4] sm:$0xff] (!%p1276_p1)   ;;  %v1619_v34 = vld [vmem:[%s2425_s4 + $0x8] sm:$0xff] (!%p1276_p1)   ;;  %v706_v37 = vlaneseq (!%p1276_p1)  ;;  %vm725_vm5 = vcmask (!%p1276_p1), 261120   ;;  %v1974_v55 = vmov (!%p1276_p1), 0   ;;  %vm810_vm8 = vcmask (!%p1276_p1), 7168  }
 0x3e0   : > { %624 = sbr.rel (%p1276_p1) target bundleno = 2033 (0x7f1), region = 56  ;;  %1361 = vmatprep.subr.bf16.mxu0 (!%p1276_p1), %v1618_v33  ;;  %v1620_v35 = vld [vmem:[%s2417_s20] sm:$0xff] (!%p1276_p1)   ;;  %v1621_v36 = vld [vmem:[%s2417_s20 + $0x8] sm:$0xff] (!%p1276_p1)   ;;  %1617 = vset.pattern.permute.xlu1 (!%p1276_p1), %v1974_v55 }
 0x3e1   : > { %1362 = vmatpush3.bf16.xpose.msra.mxu0 (!%p1276_p1), %v1618_v33  ;;  %1365 = vmatprep.mubr.bf16.mxu0 (!%p1276_p1), %v1620_v35  ;;  %v707_v38 = vshrl.u32 (!%p1276_p1), %v706_v37, 7  ;;  %v712_v40 = vand.u32 (!%p1276_p1), 127, %v706_v37  ;;  %v723_v56 = vld [vmem:[#allocation2 + $0x10] sm:$0xff] (!%p1276_p1)  ;;  %v721_v57 = vld [vmem:[#allocation2] sm:$0xff] (!%p1276_p1)  ;;  %v724_v62 = vld [vmem:[#allocation2 + $0x18] sm:$0xff] (!%p1276_p1) }
 0x3e2   : > { %1363 = vmatprep.subr.bf16.mxu0 (!%p1276_p1), %v1619_v34  ;;  %1616 = vset.pattern.permute.xlu0 (!%p1276_p1), %v1974_v55  ;;  %v722_v0 = vld [vmem:[#allocation2 + $0x8] sm:$0xff] (!%p1276_p1) }
 0x3e3   : > { %v709_v39 = vadd.s32 (!%p1276_p1), 16, %v707_v38  ;;  %v710_v41 = vadd.s32 (!%p1276_p1), 24, %v707_v38  ;;  %v708_v42 = vadd.s32 (!%p1276_p1), 8, %v707_v38  ;;  %vm713_vm4 = vcmp.ge.s32.totalorder (!%p1276_p1), %v707_v38, %v712_v40  ;;  %v1622_v38 = vld [vmem:[%s2432_s29] sm:$0xff] (!%p1276_p1)  }
 0x3e4   : > { %1377 = vmatprep.subr.bf16.mxu1 (!%p1276_p1), %v1622_v38 }
 0x3e5   : > { %vm715_vm3 = vcmp.ge.s32.totalorder (!%p1276_p1), %v709_v39, %v712_v40  ;;  %vm716_vm6 = vcmp.ge.s32.totalorder (!%p1276_p1), %v710_v41, %v712_v40  ;;  %vm714_vm7 = vcmp.ge.s32.totalorder (!%p1276_p1), %v708_v42, %v712_v40  ;;  %v1623_v39 = vld [vmem:[%s2432_s29 + $0x8] sm:$0xff] (!%p1276_p1)   ;;  %1378 = vmatpush3.bf16.msra.mxu1 (!%p1276_p1), %v1622_v38  ;;  %v1624_v40 = vld [vmem:[%s2432_s29 + $0x10] sm:$0xff] (!%p1276_p1)   ;;  %v1625_v41 = vld [vmem:[%s2432_s29 + $0x18] sm:$0xff] (!%p1276_p1)  }
 0x3e6   : > { %1379 = vmatprep.subr.bf16.mxu1 (!%p1276_p1), %v1623_v39  ;;  %v1626_v42 = vld [vmem:[%s2432_s29 + $0x20] sm:$0xff] (!%p1276_p1)  }
 0x3e9   : > { %1364 = vmatpush3.bf16.xpose.msra.mxu0 %v1619_v34  ;;  %1380 = vmatpush3.bf16.msra.mxu1 %v1623_v39 }
 0x3ea   : > { %1369 = vmatprep.subr.bf16.mxu0 %v1618_v33  ;;  %1381 = vmatprep.subr.bf16.mxu1 %v1624_v40 }
 0x3ed   : > { %1382 = vmatpush3.bf16.msra.mxu1 %v1624_v40 }
 0x3ee   : > { %1383 = vmatprep.subr.bf16.mxu1 %v1625_v41 }
 0x3f0   : > { %1366 = vmatmul.mubr.bf16.vlgmr.msra.gmra.mrb[0].mxu0 %v1621_v36 }
 0x3f1   : > { %1370 = vmatpush3.bf16.msra.mxu0 %v1618_v33  ;;  %1384 = vmatpush3.bf16.msra.mxu1 %v1625_v41 }
 0x3f2   : > { %1371 = vmatprep.subr.bf16.mxu0 %v1619_v34  ;;  %1385 = vmatprep.subr.bf16.mxu1 %v1626_v42 }
 0x3f5   : > { %1372 = vmatpush3.bf16.msra.mxu0 %v1619_v34  ;;  %1386 = vmatpush3.bf16.msra.mxu1 %v1626_v42 }
 0x4c3   : > { %v1367_v43 = vpop.f32.mrb[0].mxu0 }
 0x4c4   : > { %v719_v44 = vsel %vm715_vm3, %v1367_v43, -1e+30  ;;  %v691_v45 = vpop.f32.mrb[1].mxu0  ;;  %v786_v43 = vld [vmem:[#allocation3] sm:$0xff] }
 0x4c5   : > { %v717_v46 = vsel %vm713_vm4, %v691_v45, -1e+30  ;;  %v1368_v47 = vpop.f32.mrb[2].mxu0  ;;  %v732_v48 = vsel %vm725_vm5, %v719_v44, -inf }
 0x4c6   : > { %v720_v49 = vsel %vm716_vm6, %v1368_v47, -1e+30  ;;  %733 = vmax.xlane.f32.xlu1 %v732_v48  ;;  %v694_v50 = vpop.f32.mrb[3].mxu0  ;;  %v726_v51 = vsel %vm725_vm5, %v717_v46, -inf  ;;  %v787_v47 = vld [vmem:[#allocation3 + $0x8] sm:$0xff] }
 0x4c7   : > { %v718_v52 = vsel %vm714_vm7, %v694_v50, -1e+30  ;;  %727 = vmax.xlane.f32.xlu0 %v726_v51  ;;  %v735_v53 = vsel %vm725_vm5, %v720_v49, -inf }
 0x4c8   : > { %v729_v54 = vsel %vm725_vm5, %v718_v52, -inf }
 0x4ca   : > { %736 = vmax.xlane.f32.xlu1 %v735_v53  ;;  %v789_v53 = vld [vmem:[#allocation3 + $0x18] sm:$0xff] }
 0x4cb   : > { %730 = vmax.xlane.f32.xlu0 %v729_v54 }
 0x553   : > { %v734_v58 = vpop.xlane.xlu1 %733 }
 0x554   : > { %v740_v59 = vmax.f32 %v723_v56, %v734_v58  ;;  %v728_v60 = vpop.xlane.xlu0 %727 }
 0x555   : > { %v738_v61 = vmax.f32 %v721_v57, %v728_v60 }
 0x556   : > { %v744_v63 = vsub.f32 %v723_v56, %v740_v59  ;;  %910 = vst.msk [vmem:[#allocation2 + $0x10] sm:$0xff] %vm810_vm8, %v740_v59  ;;  %766 = vperm.xlu1 %1617, %v740_v59  }
 0x557   : > { %v742_v1 = vsub.f32 %v721_v57, %v738_v61  ;;  %908 = vst.msk [vmem:[#allocation2] sm:$0xff] %vm810_vm8, %v738_v61  ;;  %v737_v2 = vpop.xlane.xlu1 %736  ;;  %756 = vperm.xlu0 %1616, %v738_v61  }
 0x558   : > { %v741_v3 = vmax.f32 %v724_v62, %v737_v2  ;;  %v731_v4 = vpop.xlane.xlu0 %730  ;;  %v750_v32 = vmul.f32 1.442695, %v744_v63  ;;  %v1628_v2 = vld [vmem:[%s2432_s29 + $0x30] sm:$0xff]  }
 0x559   : > { %v739_v5 = vmax.f32 %v722_v0, %v731_v4  ;;  %v746_v30 = vmul.f32 1.442695, %v742_v1 }
 0x55a   : > { %v745_v6 = vsub.f32 %v724_v62, %v741_v3  ;;  %911 = vst.msk [vmem:[#allocation2 + $0x18] sm:$0xff] %vm810_vm8, %v741_v3 }
 0x55b   : > { %v743_v7 = vsub.f32 %v722_v0, %v739_v5  ;;  %909 = vst.msk [vmem:[#allocation2 + $0x8] sm:$0xff] %vm810_vm8, %v739_v5  ;;  %761 = vperm.xlu1 %1617, %v739_v5   ;;  %v1627_v0 = vld [vmem:[%s2432_s29 + $0x28] sm:$0xff]   ;;  %v1629_v5 = vld [vmem:[%s2432_s29 + $0x38] sm:$0xff]  }
 0x55c   : > { %v752_v33 = vmul.f32 1.442695, %v745_v6  ;;  %1387 = vmatprep.subr.bf16.mxu1 %v1627_v0 }
 0x55d   : > { %v748_v31 = vmul.f32 1.442695, %v743_v7  ;;  %1388 = vmatpush3.bf16.msra.mxu1 %v1627_v0 }
 0x55e   : > { %1389 = vmatprep.subr.bf16.mxu1 %v1628_v2 }
 0x55f   : > { %771 = vperm.xlu1 %1617, %v741_v3  }
 0x561   : > { %1390 = vmatpush3.bf16.msra.mxu1 %v1628_v2 }
 0x562   : > { %1391 = vmatprep.subr.bf16.mxu1 %v1629_v5 }
 0x565   : > { %1392 = vmatpush3.bf16.msra.mxu1 %v1629_v5 }
 0x5d5   : > { %v767_v8 = vpop.permute.xlu1 %766 }
 0x5d6   : > { %v776_v9 = vsub.f32 %v719_v44, %v767_v8  ;;  %v757_v10 = vpop.permute.xlu0 %756  ;;  %v817_v8 = vld [vmem:[#allocation4 + $0x10] sm:$0xff] }
 0x5d7   : > { %v774_v11 = vsub.f32 %v717_v46, %v757_v10  ;;  %v788_v46 = vld [vmem:[#allocation3 + $0x10] sm:$0xff]  ;;  %v818_v10 = vld [vmem:[#allocation4 + $0x18] sm:$0xff] }
 0x5d8   : > { %v782_v12 = vmul.f32 1.442695, %v776_v9  ;;  %v815_v9 = vld [vmem:[#allocation4] sm:$0xff] }
 0x5d9   : > { %v778_v13 = vmul.f32 1.442695, %v774_v11 }
 0x5da   : > { %v762_v14 = vpop.permute.xlu1 %761 }
 0x5db   : > { %1630 = vpow2.f32 %v778_v13  ;;  %v775_v15 = vsub.f32 %v718_v52, %v762_v14 }
 0x5dc   : > { %1632 = vpow2.f32 %v782_v12  ;;  %v816_v12 = vld [vmem:[#allocation4 + $0x8] sm:$0xff] }
 0x5dd   : > { %v780_v16 = vmul.f32 1.442695, %v775_v15 }
 0x5de   : > { %v772_v17 = vpop.permute.xlu1 %771 }
 0x5df   : > { %1634 = vpow2.f32 %v780_v16  ;;  %v777_v18 = vsub.f32 %v720_v49, %v772_v17 }
 0x5e1   : > { %v784_v19 = vmul.f32 1.442695, %v777_v18 }
 0x5e3   : > { %1636 = vpow2.f32 %v784_v19 }
 0x5e4   : > { %1638 = vpow2.f32 %v746_v30 }
 0x5e5   : > { %v1631_v20 = vpop.eup %1630  ;;  %1640 = vpow2.f32 %v748_v31 }
 0x5e6   : > { %v794_v21 = vsel %vm725_vm5, %v1631_v20, 0.0  ;;  %v1633_v22 = vpop.eup %1632  ;;  %1642 = vpow2.f32 %v750_v32 }
 0x5e7   : > { %795 = vadd.xlane.f32.xlu1 %v794_v21  ;;  %v800_v25 = vsel %vm725_vm5, %v1633_v22, 0.0  ;;  %1644 = vpow2.f32 %v752_v33 }
 0x5e9   : > { %v1635_v23 = vpop.eup %1634 }
 0x5ea   : > { %v797_v24 = vsel %vm725_vm5, %v1635_v23, 0.0  ;;  %v843_v26 = vpack.c.bf16 %v1635_v23, %v1631_v20 }
 0x5eb   : > { %798 = vadd.xlane.f32.xlu0 %v797_v24  ;;  %801 = vadd.xlane.f32.xlu1 %v800_v25 }
 0x5ec   : > { %1373 = vmatprep.mubr.msk.bf16.mxu0 %vm725_vm5, %v843_v26 }
 0x5ed   : > { %v1637_v27 = vpop.eup %1636 }
 0x5ee   : > { %v803_v28 = vsel %vm725_vm5, %v1637_v27, 0.0  ;;  %v844_v29 = vpack.c.bf16 %v1637_v27, %v1633_v22  ;;  %v1639_v34 = vpop.eup %1638 }
 0x5ef   : > { %804 = vadd.xlane.f32.xlu1 %v803_v28  ;;  %v1641_v35 = vpop.eup %1640  ;;  %v790_v44 = vmul.f32 %v1639_v34, %v786_v43 }
 0x5f0   : > { %1374 = vmatmul.mubr.msk.bf16.vlgmr.msra.gmra.mrb[4].mxu0 %vm725_vm5, %v844_v29  ;;  %v1643_v36 = vpop.eup %1642  ;;  %v791_v50 = vmul.f32 %v1641_v35, %v787_v47 }
 0x5f1   : > { %v1645_v37 = vpop.eup %1644  ;;  %v792_v49 = vmul.f32 %v1643_v36, %v788_v46 }
 0x5f2   : > { %v793_v56 = vmul.f32 %v1645_v37, %v789_v53 }
 0x600   : > { %821 = vperm.xlu1 %1617, %v1639_v34  }
 0x601   : > { %826 = vperm.xlu0 %1616, %v1641_v35  }
 0x604   : > { %831 = vperm.xlu1 %1617, %v1643_v36  }
 0x608   : > { %836 = vperm.xlu1 %1617, %v1645_v37  }
 0x674   : > { %v796_v45 = vpop.xlane.xlu1 %795 }
 0x675   : > { %v806_v48 = vadd.f32 %v796_v45, %v790_v44 }
 0x677   : > { %811 = vst.msk [vmem:[#allocation3] sm:$0xff] %vm810_vm8, %v806_v48 }
 0x678   : > { %v802_v51 = vpop.xlane.xlu1 %801  ;;  %v799_v52 = vpop.xlane.xlu0 %798 }
 0x679   : > { %v808_v54 = vadd.f32 %v802_v51, %v792_v49  ;;  %v807_v55 = vadd.f32 %v799_v52, %v791_v50 }
 0x67b   : > { %813 = vst.msk [vmem:[#allocation3 + $0x10] sm:$0xff] %vm810_vm8, %v808_v54  ;;  %812 = vst.msk [vmem:[#allocation3 + $0x8] sm:$0xff] %vm810_vm8, %v807_v55 }
 0x67c   : > { %v805_v57 = vpop.xlane.xlu1 %804 }
 0x67d   : > { %v809_v58 = vadd.f32 %v805_v57, %v793_v56 }
 0x67e   : > { %v912_v59 = vld [vmem:[#allocation3] sm:$0xff] }
 0x67f   : > { %814 = vst.msk [vmem:[#allocation3 + $0x18] sm:$0xff] %vm810_vm8, %v809_v58  ;;  %1646 = vrcp.f32 %v912_v59 }
 0x680   : > { %v822_v6 = vpop.permute.xlu1 %821  ;;  %v827_v13 = vpop.permute.xlu0 %826 }
 0x681   : > { %v839_v15 = vmul.f32 %v822_v6, %v815_v9  ;;  %v840_v20 = vmul.f32 %v827_v13, %v816_v12 }
 0x682   : > { %v914_v60 = vld [vmem:[#allocation3 + $0x10] sm:$0xff]  ;;  %v913_v61 = vld [vmem:[#allocation3 + $0x8] sm:$0xff] }
 0x683   : > { %1648 = vrcp.f32 %v914_v60 }
 0x684   : > { %1650 = vrcp.f32 %v913_v61  ;;  %v832_v7 = vpop.permute.xlu1 %831 }
 0x685   : > { %v841_v14 = vmul.f32 %v832_v7, %v817_v8 }
 0x686   : > { %v915_v62 = vld [vmem:[#allocation3 + $0x18] sm:$0xff] }
 0x687   : > { %1652 = vrcp.f32 %v915_v62 }
 0x688   : > { %v837_v11 = vpop.permute.xlu1 %836 }
 0x689   : > { %v1647_v63 = vpop.eup %1646  ;;  %v842_v17 = vmul.f32 %v837_v11, %v818_v10 }
 0x68a   : > { %926 = vperm.xlu1 %1617, %v1647_v63  }
 0x68d   : > { %v1649_v1 = vpop.eup %1648 }
 0x68e   : > { %v1651_v3 = vpop.eup %1650  ;;  %936 = vperm.xlu1 %1617, %v1649_v1  }
 0x68f   : > { %931 = vperm.xlu0 %1616, %v1651_v3  }
 0x691   : > { %v1653_v4 = vpop.eup %1652 }
 0x693   : > { %941 = vperm.xlu0 %1616, %v1653_v4  }
 0x6c3   : > { %v1375_v16 = vpop.f32.mrb[4].mxu0 }
 0x6c4   : > { %v902_v18 = vadd.f32 %v1375_v16, %v841_v14  ;;  %v885_v19 = vpop.f32.mrb[5].mxu0 }
 0x6c5   : > { %v900_v21 = vadd.f32 %v885_v19, %v839_v15  ;;  %v1376_v22 = vpop.f32.mrb[6].mxu0 }
 0x6c6   : > { %906 = vst [vmem:[#allocation4 + $0x10] sm:$0xff] %v902_v18  ;;  %v903_v23 = vadd.f32 %v1376_v22, %v842_v17  ;;  %v888_v24 = vpop.f32.mrb[7].mxu0 }
 0x6c7   : > { %904 = vst [vmem:[#allocation4] sm:$0xff] %v900_v21  ;;  %v901_v25 = vadd.f32 %v888_v24, %v840_v20 }
 0x6c8   : > { %907 = vst [vmem:[#allocation4 + $0x18] sm:$0xff] %v903_v23 }
 0x6c9   : > { %905 = vst [vmem:[#allocation4 + $0x8] sm:$0xff] %v901_v25 }
 0x709   : > { %v927_v26 = vpop.permute.xlu1 %926 }
 0x70a   : > { %v944_v28 = vmul.f32 %v927_v26, %v900_v21 }
 0x70d   : > { %v937_v30 = vpop.permute.xlu1 %936 }
 0x70e   : > { %v932_v27 = vpop.permute.xlu0 %931  ;;  %v946_v33 = vmul.f32 %v937_v30, %v902_v18 }
 0x70f   : > { %v945_v29 = vmul.f32 %v932_v27, %v901_v25 }
 0x711   : > { %v948_v31 = vpack.c.bf16 %v945_v29, %v944_v28 }
 0x712   : > { %v942_v32 = vpop.permute.xlu0 %941 }
 0x713   : > { %v947_v34 = vmul.f32 %v942_v32, %v903_v23  ;;  %1393 = vmatprep.mubr.bf16.mxu1 %v948_v31 }
 0x715   : > { %v949_v35 = vpack.c.bf16 %v947_v34, %v946_v33 }
 0x717   : > { %1394 = vmatmul.mubr.bf16.vlgmr.msra.gmra.mrb[0].mxu1 %v949_v35 }
 0x7ea   : > { %v1395_v36 = vpop.f32.mrb[0].mxu1 }
 0x7eb   : > { %v1048_v37 = vpop.f32.mrb[1].mxu1 }
 0x7ec   : > { %v1396_v38 = vpop.f32.mrb[2].mxu1 }
 0x7ed   : > { %v1316_v39 = vpack.c.bf16 %v1396_v38, %v1395_v36  ;;  %v1051_v40 = vpop.f32.mrb[3].mxu1 }
 0x7ee   : > { %v1311_v41 = vpack.c.bf16 %v1051_v40, %v1048_v37 }
 0x7ef   : > { %1318 = vst [vmem:[%s2447_s15 + $0x8] sm:$0xff] %v1316_v39  }
 0x7f0   : > { %1312 = vst [vmem:[%s2447_s15] sm:$0xff] %v1311_v41  }
 0x7f1 PF: > { %s2722_s0 = sld [smem:[#allocation35_spill]]  ;;  %s2724_s20 = sld [smem:[#allocation29_spill]] }
 0x7f2   : > { %s2725_s26 = sld [smem:[#allocation31_spill]]  ;;  %s2726_s2 = sld [smem:[#allocation30_spill]] }
 0x7f3   : > { %s2727_s5 = sld [smem:[#allocation26_spill]]  ;;  %s1102_s27 = sshll.u32 %s2447_s15, 4  ;;  %s2515_s27 = int_to_ptr.vmem [resolvable:$true] %s1102_s27 }
 0x7f4   : > { %s2728_s7 = sld [smem:[#allocation46_spill]]  ;;  %s1975_s15 = smov [#allocation14]  }
 0x7f7   : > { %p2723_p12 = scmp.ne.s32.totalorder %s2722_s0, 0 }
 0x7f8   : > { %s1298_s13 = sshll.u32 %s2725_s26, 5  ;;  %s1770_s26 = sshll.u32 %s1975_s15, 4  ;;  %s1771_s26 = int_to_ptr.vmem [resolvable:$false] %s1770_s26 }
 0x7f9   : > { %s1407_s12 = scalar_select %p2723_p12, [#allocation6], [#allocation17] }
 0x7fa   : > { %s2774_s20 = smov (!%p2723_p12, %s2724_s20), 0  ;;  %s2729_s23 = sand.u32 1, %s2727_s5  }
 0x7fb   : > { %s1091_s4 = sld [smem:[%s1407_s12 + %s2774_s20]]  ;;  %s2525_s22 = scalar_lea.sflag [#allocation10], %s2729_s23 }
 0x7fc   : > { %s1766_s20 = scalar_lea.vmem %s2515_s27, 256  ;;  %s1772_s12 = scalar_lea.vmem %s1771_s26, 512 }
 0x7fd   : > { %p1767_p13 = scmp.ne.s32.totalorder %s2515_s27, %s1766_s20  ;;  %p1773_p9 = scmp.lt.s32.totalorder %s2515_s27, %s1771_s26 }
 0x7fe   : > { %p1774_p2 = scmp.lt.s32.totalorder %s1772_s12, %s1766_s20 }
 0x7ff   : > { %p1768_p3 = pnand %p1767_p13, %p2723_p12 }
 0x800   : > { %p1775_p5 = por %p1774_p2, %p1773_p9 }
 0x801   : > { %s1307_s29 = sshll.u32 %s1091_s4, 3  ;;  %p1769_p4 = pneg %p1768_p3 }
 0x802   : > { %s1097_s25 = sadd.s32 %s2726_s2, %s1307_s29 }
 0x803   : > { %s1099_s30 = sadd.s32 %s1298_s13, %s1097_s25  ;;  %p1776_p10 = pnand %p1775_p5, %p1769_p4 }
 0x804   : > { %s1299_s9 = sshll.u32 %s1099_s30, 6 }
 0x805   : > { %s2521_s6 = scalar_lea.hbm %s2728_s7, %s1299_s9 }
 0x806   : > { %1779 = shalt.err (!%p1776_p10)
}
 0x807   : > { %s1780_s23 = scalar_lea.hbm %s2521_s6, 256  ;;  %s1784_s4 = scalar_lea.hbm %s2728_s7, 4096 }
 0x808   : > { %p1781_p0 = scmp.ne.s32.totalorder %s2521_s6, %s1780_s23  ;;  %p1785_p8 = scmp.lt.u32.totalorder %s2521_s6, %s2728_s7 }
 0x809   : > { %p1786_p7 = scmp.lt.u32.totalorder %s1784_s4, %s1780_s23  ;;  %p1788_p13 = scmp.lt.u32.totalorder %s1780_s23, %s2521_s6 }
 0x80a   : > { %p1782_p6 = pnand %p1781_p0, %p2723_p12 }
 0x80b   : > { %p1787_p1 = por %p1786_p7, %p1785_p8 }
 0x80c   : > { %p1783_p11 = pneg %p1782_p6 }
 0x80d   : > { %p1789_p3 = por %p1788_p13, %p1787_p1 }
 0x80f   : > { %p1790_p4 = pnand %p1789_p3, %p1783_p11 }
 0x811   : > { %1793 = shalt.err (!%p1790_p4)
}
 0x812   : > { %s1976_s25 = smov 64   ;;  %s1977_s30 = smov 128  }
 0x813   : > { %s1978_s9 = smov 4  }
 0x814   : > { %1409 = dma.vmem_to_hbm [thread:$0]  (%p2723_p12), %s2515_s27, 256, %s2521_s6, %s2525_s22, %s1976_s25, %s1977_s30, %s1978_s9  }
 0x815 PF: > { %s2730_s19 = sld [smem:[#allocation25_spill]]  ;;  %s2731_s18 = sld [smem:[#allocation36_spill]] }
 0x816   : > { %p1430_p9 = scmp.ge.s32.totalorder %s1962_s24, 2 }
 0x81b   : > { %s1117_s20 = sand.u32 1, %s2730_s19   ;;  %p2732_p2 = scmp.ne.s32.totalorder %s2731_s18, 0 }
 0x81c   : > { %s1118_s15 = scalar_lea.sflag [#allocation10], %s1117_s20 }
 0x81d   : > { %p1426_p5 = pnand %p1430_p9, %p2732_p2 }
 0x81f   : > { %1885 = dma.done.wait (!%p1426_p5), %s1118_s15, 256  }
 0x820   : > { %1887 = vsyncadd (!%p1426_p5), %s1118_s15, 4294967040  ;;  %s32_s24 = sadd.s32 1, %s1962_s24   ;;  %s2734_s0 = sld [smem:[#allocation26_spill]] }
 0x821   : > { %p2554_p10 = scmp.ge.s32.totalorder %s32_s24, 42   ;;  %s2735_s12 = sld [smem:[#allocation27_spill]] }
 0x822   : > { %s2736_s22 = smov %s2271_s1  ;;  %s2737_s15 = sld [smem:[#allocation28_spill]] }
 0x823   : > { %s2738_s19 = sld [smem:[#allocation32_spill]]  ;;  %s2739_s20 = sld [smem:[#allocation33_spill]] }
 0x824   : > { %s2740_s6 = sld [smem:[#allocation39_spill]]  ;;  %s2741_s27 = sld [smem:[#allocation40_spill]] }
 0x825   : > { %s2742_s1 = smov %s1898_s8  ;;  %s2743_s23 = sld [smem:[#allocation42_spill]] }
 0x826   : > { %s2744_s8 = smov %s2284_s16  ;;  %s2745_s9 = smov %s1906_s10 }
 0x827   : > { %s2746_s10 = smov %s1910_s11  ;;  %s2747_s11 = smov %s2366_s3 }
 0x828   : > { %s2748_s13 = smov %s1922_s14  ;;  %s2749_s14 = smov %s2736_s22 }
 0x829   : > { %s2750_s16 = smov %s1934_s17  ;;  %s2751_s17 = smov %s2276_s28 }
 0x82a   : > { %s2752_s18 = smov %s1950_s21  ;;  %s2753_s21 = smov %s2740_s6 }
 0x82b   : > { %s2754_s22 = smov %s2741_s27  ;;  %31 = sbr.rel (!%p2554_p10) target bundleno = 38 (0x26), region = 113 }
 0x832   :  { %1123 = vsyncpa [#allocation9], 1 }
 0x833   :  { %1125 = vsyncpa [#allocation9 + $0x1], 1 }
 0x834   :  { %1126 = vsyncpa [#allocation12], 1 }
 0x835   :  { %1128 = vsyncpa [#allocation12 + $0x1], 1 }
 0x836   :  { %1129 = vsyncpa [#allocation10], 1 }
 0x837   :  { %1131 = vsyncpa [#allocation10 + $0x1], 1 }

</bundles_post_ra>
